<compile_context>
chip_gen: v5e
topology: v5e:2x2
jax: 0.10.0
libtpu: 0.0.40
codegen_flags: <defaults>
</compile_context>

<pallas_src>
import math

import jax
import jax.numpy as jnp
import numpy as np
from jax.experimental import pallas as pl
from jax.experimental.pallas import tpu as pltpu

# ---------------- model config (small, consistent with the module) -------------
INPUT_SIZE = 4
HIDDEN_SIZE = 32
OUTPUT_SIZE = 1
NUM_LAYERS = 2          # kernel below is written for exactly 2 layers
BATCH = 2
SEQ = 8

LANE = 128              # hardware lane width; 4 gates * H = 128 packed gate lanes
SUBLANE = 8


# ------------------------------- Pallas kernel --------------------------------
def lstm_predict_kernel(x_ref, h0_ref, c0_ref,
                        wih0_ref, whh0_ref, b0_ref,
                        wih1_ref, whh1_ref, b1_ref,
                        fcw_ref, fcb_ref,
                        out_ref):
    """2-layer LSTM over the sequence + final FC for one batch chunk.

    x_ref:    (1, T*Bc, I)       time-major, flattened over (t, b) within chunk
    h0/c0:    (1, L, Bc, H)      initial states
    wih/whh:  (in, 4*H)=( ,128)  packed gate weights, gate order i,f,g,o
    b:        (1, 4*H)           b_ih + b_hh, same packed layout
    fcw:      (H, 128) lane-padded FC weight, fcb (1, 128)
    out_ref:  (1, ROWS_P, 128)   rows = [layer0 batch..., layer1 batch..., pad]
    """
    TB = x_ref.shape[1]
    Bc = h0_ref.shape[2]
    T = TB // Bc
    H = whh0_ref.shape[0]           # 32 ; packed gates = 4*H = 128 lanes
    rows = NUM_LAYERS * Bc
    rows_p = out_ref.shape[1]

    # ---- loop-invariant loads hoisted out of the recurrence ----
    # (H, 4H) = (32, 128) = 4 vregs each -> truly register resident, no spill.
    whh0 = whh0_ref[...]
    whh1 = whh1_ref[...]
    h0 = h0_ref[0]                  # (L, Bc, H), tiny
    c0 = c0_ref[0]

    def cell(gx_t, h, c, whh):
        # gx_t already holds x_t @ W_ih + (b_ih + b_hh); only the recurrent
        # matmul (one MXU pass: (Bc,32)@(32,128)) sits on the serial chain.
        gates = gx_t + jnp.dot(h, whh, preferred_element_type=jnp.float32)
        # One sigmoid pass and one tanh pass over the whole packed gate vreg,
        # then 32-lane sub-slices (gate order i,f,g,o preserved).
        sg = jax.nn.sigmoid(gates)
        th = jnp.tanh(gates)
        i = sg[:, 0 * H:1 * H]
        f = sg[:, 1 * H:2 * H]
        g = th[:, 2 * H:3 * H]
        o = sg[:, 3 * H:4 * H]
        c_new = f * c + i * g
        h_new = o * jnp.tanh(c_new)
        return h_new, c_new

    # ---------------- layer 0 ----------------
    # One batched (T*Bc, I) x (I, 128) matmul covers every time step's input gates.
    x = x_ref[0]                                          # (T*Bc, I)
    gx0 = jnp.dot(x, wih0_ref[...],
                  preferred_element_type=jnp.float32) + b0_ref[...]

    h = h0[0]
    c = c0[0]
    seq0 = []
    for t in range(T):                                    # static unroll; h/c in vregs
        h, c = cell(gx0[t * Bc:(t + 1) * Bc, :], h, c, whh0)
        seq0.append(h)                                    # kept as register values
    h_fin0 = h

    # ---------------- layer 1 ----------------
    seq0 = jnp.concatenate(seq0, axis=0)                  # (T*Bc, H), no VMEM round trip
    gx1 = jnp.dot(seq0, wih1_ref[...],
                  preferred_element_type=jnp.float32) + b1_ref[...]

    h = h0[1]
    c = c0[1]
    for t in range(T):
        h, c = cell(gx1[t * Bc:(t + 1) * Bc, :], h, c, whh1)
    h_fin1 = h

    # ------------- fc(h_out.view(-1, H)) -------------
    h_out = jnp.concatenate([h_fin0, h_fin1], axis=0)     # (L*Bc, H)
    if rows_p > rows:                                     # sublane-pad the output slab
        h_out = jnp.concatenate(
            [h_out, jnp.zeros((rows_p - rows, H), jnp.float32)], axis=0)
    out_ref[0] = (jnp.dot(h_out, fcw_ref[...],
                          preferred_element_type=jnp.float32) + fcb_ref[...])


# ------------------------------- wrapper ---------------------------------------
def lstm_predict(x_bti, h0, c0, params, *, batch_chunk=None):
    """x_bti: (B, T, I) batch_first, like the PyTorch module. Returns (L*B, O).

    batch_chunk < B splits the batch over a parallel grid axis so v7x can run
    chunks on both TensorCores; default (full batch) keeps a single invocation.
    """
    B, T, I = x_bti.shape
    H = HIDDEN_SIZE
    O = OUTPUT_SIZE
    L = NUM_LAYERS
    G = 4 * H                                   # packed gate width (=128)
    assert G == LANE, "kernel assumes 4*hidden_size == 128 lanes"
    Bc = B if batch_chunk is None else batch_chunk
    assert B % Bc == 0
    nc = B // Bc
    rows = L * Bc
    rows_p = ((rows + SUBLANE - 1) // SUBLANE) * SUBLANE   # lane/sublane-dense out slab

    # ---- chunk the batch; within a chunk, x is time-major flattened (t, b) ----
    xt = jnp.transpose(x_bti, (1, 0, 2))                               # (T, B, I)
    xc = xt.reshape(T, nc, Bc, I).transpose(1, 0, 2, 3).reshape(nc, T * Bc, I)
    h0c = h0.reshape(L, nc, Bc, H).transpose(1, 0, 2, 3)               # (nc, L, Bc, H)
    c0c = c0.reshape(L, nc, Bc, H).transpose(1, 0, 2, 3)

    # lane-dense FC: pad the single output column to 128 lanes
    fcw = jnp.pad(params["fcw"], ((0, 0), (0, LANE - O)))              # (H, 128)
    fcb = jnp.pad(params["fcb"], ((0, 0), (0, LANE - O)))              # (1, 128)

    def wspec(shape):
        return pl.BlockSpec(shape, lambda n, _s=shape: (0,) * len(_s))

    out = pl.pallas_call(
        lstm_predict_kernel,
        out_shape=jax.ShapeDtypeStruct((nc, rows_p, LANE), jnp.float32),
        grid=(nc,),
        in_specs=[
            pl.BlockSpec((1, T * Bc, I), lambda n: (n, 0, 0)),
            pl.BlockSpec((1, L, Bc, H), lambda n: (n, 0, 0, 0)),
            pl.BlockSpec((1, L, Bc, H), lambda n: (n, 0, 0, 0)),
            wspec((I, G)), wspec((H, G)), wspec((1, G)),
            wspec((H, G)), wspec((H, G)), wspec((1, G)),
            wspec((H, LANE)), wspec((1, LANE)),
        ],
        out_specs=pl.BlockSpec((1, rows_p, LANE), lambda n: (n, 0, 0)),
        compiler_params=pltpu.CompilerParams(
            dimension_semantics=("parallel",)),       # shards chunks across v7x TCs
    )(xc, h0c, c0c,
      params["wih0"], params["whh0"], params["b0"],
      params["wih1"], params["whh1"], params["b1"],
      fcw, fcb)

    # rows within a chunk are ordered (layer, batch-in-chunk); undo the chunking
    out = out[:, :rows, :O].reshape(nc, L, Bc, O)
    out = out.transpose(1, 0, 2, 3).reshape(L * B, O)                  # == h_n.view(-1,H) order
    return out


# ------------------------- deterministic parameter init -------------------------
def init_params(key):
    H, I, O, L, B = HIDDEN_SIZE, INPUT_SIZE, OUTPUT_SIZE, NUM_LAYERS, BATCH
    ks = jax.random.split(key, 16)
    stdv = 1.0 / math.sqrt(H)  # PyTorch LSTM / Linear default: U(-1/sqrt(H), 1/sqrt(H))

    def u(k, shape):
        return jax.random.uniform(k, shape, jnp.float32, minval=-stdv, maxval=stdv)

    # nn.LSTM weights (stored already transposed to (in, 4H)); gate order i,f,g,o
    wih0 = u(ks[0], (I, 4 * H))
    whh0 = u(ks[1], (H, 4 * H))
    b0 = (u(ks[2], (4 * H,)) + u(ks[3], (4 * H,)))[None, :]
    wih1 = u(ks[4], (H, 4 * H))
    whh1 = u(ks[5], (H, 4 * H))
    b1 = (u(ks[6], (4 * H,)) + u(ks[7], (4 * H,)))[None, :]
    # nn.Linear(H, O), stored as (H, O)
    fcw = u(ks[8], (H, O))
    fcb = u(ks[9], (O,))[None, :]

    # h_0 / c_0: xavier_normal_ on a (L, B, H) tensor
    # fan_in = B*H, fan_out = L*H  (PyTorch convention for >2-D tensors)
    xav_std = math.sqrt(2.0 / (B * H + L * H))
    h0 = xav_std * jax.random.normal(ks[10], (L, B, H), jnp.float32)
    c0 = xav_std * jax.random.normal(ks[11], (L, B, H), jnp.float32)

    params = dict(wih0=wih0, whh0=whh0, b0=b0,
                  wih1=wih1, whh1=whh1, b1=b1,
                  fcw=fcw, fcb=fcb)
    return params, h0, c0, ks[12]


# ------------------------------ pure-JAX reference ------------------------------
def reference_forward(x_bti, h0, c0, params):
    B, T, _ = x_bti.shape
    H = HIDDEN_SIZE

    def run_layer(layer_in, h, c, wih, whh, b):
        outs = []
        for t in range(T):
            gates = layer_in[:, t, :] @ wih + h @ whh + b
            i = jax.nn.sigmoid(gates[:, 0 * H:1 * H])
            f = jax.nn.sigmoid(gates[:, 1 * H:2 * H])
            g = jnp.tanh(gates[:, 2 * H:3 * H])
            o = jax.nn.sigmoid(gates[:, 3 * H:4 * H])
            c = f * c + i * g
            h = o * jnp.tanh(c)
            outs.append(h)
        return jnp.stack(outs, axis=1), h

    seq0, hL0 = run_layer(x_bti, h0[0], c0[0], params["wih0"], params["whh0"], params["b0"])
    _, hL1 = run_layer(seq0, h0[1], c0[1], params["wih1"], params["whh1"], params["b1"])
    h_out = jnp.concatenate([hL0, hL1], axis=0)          # h_out.view(-1, H)
    return h_out @ params["fcw"] + params["fcb"]


# ----------------------------------- main ---------------------------------------
if __name__ == "__main__":
    key = jax.random.PRNGKey(0)
    params, h0, c0, key = init_params(key)
    x = jax.random.normal(key, (BATCH, SEQ, INPUT_SIZE), jnp.float32)

    out = lstm_predict(x, h0, c0, params)
    out = jax.block_until_ready(out)

    ref = reference_forward(x, h0, c0, params)
    assert out.shape == (NUM_LAYERS * BATCH, OUTPUT_SIZE)
    if not np.allclose(np.asarray(out), np.asarray(ref), rtol=1e-2, atol=1e-2):
        raise AssertionError("Pallas kernel output deviates from JAX reference")

    print("KERNEL_OK")
</pallas_src>

<mosaic_0001>
module attributes {stable_mosaic.version = 11 : i64} {
  func.func @lstm_predict_kernel(%arg0: i32, %arg1: memref<1x16x4xf32, #tpu.memory_space<vmem>>, %arg2: memref<1x2x2x32xf32, #tpu.memory_space<vmem>>, %arg3: memref<1x2x2x32xf32, #tpu.memory_space<vmem>>, %arg4: memref<4x128xf32, #tpu.memory_space<vmem>>, %arg5: memref<32x128xf32, #tpu.memory_space<vmem>>, %arg6: memref<1x128xf32, #tpu.memory_space<vmem>>, %arg7: memref<32x128xf32, #tpu.memory_space<vmem>>, %arg8: memref<32x128xf32, #tpu.memory_space<vmem>>, %arg9: memref<1x128xf32, #tpu.memory_space<vmem>>, %arg10: memref<32x128xf32, #tpu.memory_space<vmem>>, %arg11: memref<1x128xf32, #tpu.memory_space<vmem>>, %arg12: memref<1x8x128xf32, #tpu.memory_space<vmem>>) attributes {dimension_semantics = [#tpu.dimension_semantics<parallel>], iteration_bounds = array<i64: 1>, scalar_prefetch = 0 : i64, scratch_operands = 0 : i64, tpu.core_type = #tpu.core_type<tc>, window_params = [{transform_indices = @transform_0, window_bounds = array<i64: 1, 16, 4>}, {transform_indices = @transform_1, window_bounds = array<i64: 1, 2, 2, 32>}, {transform_indices = @transform_2, window_bounds = array<i64: 1, 2, 2, 32>}, {pipeline_mode = #tpu.pipeline_mode<synchronous>, transform_indices = @transform_3, window_bounds = array<i64: 4, 128>}, {pipeline_mode = #tpu.pipeline_mode<synchronous>, transform_indices = @transform_4, window_bounds = array<i64: 32, 128>}, {pipeline_mode = #tpu.pipeline_mode<synchronous>, transform_indices = @transform_5, window_bounds = array<i64: 1, 128>}, {pipeline_mode = #tpu.pipeline_mode<synchronous>, transform_indices = @transform_6, window_bounds = array<i64: 32, 128>}, {pipeline_mode = #tpu.pipeline_mode<synchronous>, transform_indices = @transform_7, window_bounds = array<i64: 32, 128>}, {pipeline_mode = #tpu.pipeline_mode<synchronous>, transform_indices = @transform_8, window_bounds = array<i64: 1, 128>}, {pipeline_mode = #tpu.pipeline_mode<synchronous>, transform_indices = @transform_9, window_bounds = array<i64: 32, 128>}, {pipeline_mode = #tpu.pipeline_mode<synchronous>, transform_indices = @transform_10, window_bounds = array<i64: 1, 128>}, {transform_indices = @transform_11, window_bounds = array<i64: 1, 8, 128>}]} {
    %c0 = arith.constant 0 : index
    %c0_0 = arith.constant 0 : index
    %0 = vector.load %arg5[%c0, %c0_0] : memref<32x128xf32, #tpu.memory_space<vmem>>, vector<32x128xf32>
    %c0_1 = arith.constant 0 : index
    %c0_2 = arith.constant 0 : index
    %1 = vector.load %arg8[%c0_1, %c0_2] : memref<32x128xf32, #tpu.memory_space<vmem>>, vector<32x128xf32>
    %c0_3 = arith.constant 0 : index
    %c0_4 = arith.constant 0 : index
    %c0_5 = arith.constant 0 : index
    %c0_6 = arith.constant 0 : index
    %2 = vector.load %arg2[%c0_3, %c0_4, %c0_5, %c0_6] : memref<1x2x2x32xf32, #tpu.memory_space<vmem>>, vector<1x2x2x32xf32>
    %3 = vector.shape_cast %2 : vector<1x2x2x32xf32> to vector<2x2x32xf32>
    %c0_7 = arith.constant 0 : index
    %c0_8 = arith.constant 0 : index
    %c0_9 = arith.constant 0 : index
    %c0_10 = arith.constant 0 : index
    %4 = vector.load %arg3[%c0_7, %c0_8, %c0_9, %c0_10] : memref<1x2x2x32xf32, #tpu.memory_space<vmem>>, vector<1x2x2x32xf32>
    %5 = vector.shape_cast %4 : vector<1x2x2x32xf32> to vector<2x2x32xf32>
    %c0_11 = arith.constant 0 : index
    %c0_12 = arith.constant 0 : index
    %c0_13 = arith.constant 0 : index
    %6 = vector.load %arg1[%c0_11, %c0_12, %c0_13] : memref<1x16x4xf32, #tpu.memory_space<vmem>>, vector<1x16x4xf32>
    %7 = vector.shape_cast %6 : vector<1x16x4xf32> to vector<16x4xf32>
    %c0_14 = arith.constant 0 : index
    %c0_15 = arith.constant 0 : index
    %8 = vector.load %arg4[%c0_14, %c0_15] : memref<4x128xf32, #tpu.memory_space<vmem>>, vector<4x128xf32>
    %cst = arith.constant dense<0.000000e+00> : vector<16x128xf32>
    %9 = tpu.matmul %7, %8, %cst {dimension_numbers = #tpu.dot_dimension_numbers<[1], [0], [0], [1], [0, 0, 1, 1], [], []>} : vector<16x4xf32>, vector<4x128xf32>, vector<16x128xf32> -> vector<16x128xf32>
    %c0_16 = arith.constant 0 : index
    %c0_17 = arith.constant 0 : index
    %10 = vector.load %arg6[%c0_16, %c0_17] : memref<1x128xf32, #tpu.memory_space<vmem>>, vector<1x128xf32>
    %11 = vector.broadcast %10 : vector<1x128xf32> to vector<16x128xf32>
    %12 = arith.addf %9, %11 : vector<16x128xf32>
    %13 = vector.extract_strided_slice %3 {offsets = [0, 0, 0], sizes = [1, 2, 32], strides = [1, 1, 1]} : vector<2x2x32xf32> to vector<1x2x32xf32>
    %14 = vector.shape_cast %13 : vector<1x2x32xf32> to vector<2x32xf32>
    %15 = vector.extract_strided_slice %5 {offsets = [0, 0, 0], sizes = [1, 2, 32], strides = [1, 1, 1]} : vector<2x2x32xf32> to vector<1x2x32xf32>
    %16 = vector.shape_cast %15 : vector<1x2x32xf32> to vector<2x32xf32>
    %17 = vector.extract_strided_slice %12 {offsets = [0, 0], sizes = [2, 128], strides = [1, 1]} : vector<16x128xf32> to vector<2x128xf32>
    %cst_18 = arith.constant dense<0.000000e+00> : vector<2x128xf32>
    %18 = tpu.matmul %14, %0, %cst_18 {dimension_numbers = #tpu.dot_dimension_numbers<[1], [0], [0], [1], [0, 0, 1, 1], [], []>} : vector<2x32xf32>, vector<32x128xf32>, vector<2x128xf32> -> vector<2x128xf32>
    %19 = arith.addf %17, %18 : vector<2x128xf32>
    %20 = arith.negf %19 : vector<2x128xf32>
    %21 = math.exp %20 : vector<2x128xf32>
    %cst_19 = arith.constant 1.000000e+00 : f32
    %22 = vector.broadcast %cst_19 : f32 to vector<2x128xf32>
    %23 = arith.addf %22, %21 : vector<2x128xf32>
    %24 = arith.divf %22, %23 : vector<2x128xf32>
    %25 = math.tanh %19 : vector<2x128xf32>
    %26 = vector.extract_strided_slice %24 {offsets = [0, 0], sizes = [2, 32], strides = [1, 1]} : vector<2x128xf32> to vector<2x32xf32>
    %27 = vector.extract_strided_slice %24 {offsets = [0, 32], sizes = [2, 32], strides = [1, 1]} : vector<2x128xf32> to vector<2x32xf32>
    %28 = vector.extract_strided_slice %25 {offsets = [0, 64], sizes = [2, 32], strides = [1, 1]} : vector<2x128xf32> to vector<2x32xf32>
    %29 = vector.extract_strided_slice %24 {offsets = [0, 96], sizes = [2, 32], strides = [1, 1]} : vector<2x128xf32> to vector<2x32xf32>
    %30 = arith.mulf %27, %16 : vector<2x32xf32>
    %31 = arith.mulf %26, %28 : vector<2x32xf32>
    %32 = arith.addf %30, %31 : vector<2x32xf32>
    %33 = math.tanh %32 : vector<2x32xf32>
    %34 = arith.mulf %29, %33 : vector<2x32xf32>
    %35 = vector.extract_strided_slice %12 {offsets = [2, 0], sizes = [2, 128], strides = [1, 1]} : vector<16x128xf32> to vector<2x128xf32>
    %cst_20 = arith.constant dense<0.000000e+00> : vector<2x128xf32>
    %36 = tpu.matmul %34, %0, %cst_20 {dimension_numbers = #tpu.dot_dimension_numbers<[1], [0], [0], [1], [0, 0, 1, 1], [], []>} : vector<2x32xf32>, vector<32x128xf32>, vector<2x128xf32> -> vector<2x128xf32>
    %37 = arith.addf %35, %36 : vector<2x128xf32>
    %38 = arith.negf %37 : vector<2x128xf32>
    %39 = math.exp %38 : vector<2x128xf32>
    %cst_21 = arith.constant 1.000000e+00 : f32
    %40 = vector.broadcast %cst_21 : f32 to vector<2x128xf32>
    %41 = arith.addf %40, %39 : vector<2x128xf32>
    %42 = arith.divf %40, %41 : vector<2x128xf32>
    %43 = math.tanh %37 : vector<2x128xf32>
    %44 = vector.extract_strided_slice %42 {offsets = [0, 0], sizes = [2, 32], strides = [1, 1]} : vector<2x128xf32> to vector<2x32xf32>
    %45 = vector.extract_strided_slice %42 {offsets = [0, 32], sizes = [2, 32], strides = [1, 1]} : vector<2x128xf32> to vector<2x32xf32>
    %46 = vector.extract_strided_slice %43 {offsets = [0, 64], sizes = [2, 32], strides = [1, 1]} : vector<2x128xf32> to vector<2x32xf32>
    %47 = vector.extract_strided_slice %42 {offsets = [0, 96], sizes = [2, 32], strides = [1, 1]} : vector<2x128xf32> to vector<2x32xf32>
    %48 = arith.mulf %45, %32 : vector<2x32xf32>
    %49 = arith.mulf %44, %46 : vector<2x32xf32>
    %50 = arith.addf %48, %49 : vector<2x32xf32>
    %51 = math.tanh %50 : vector<2x32xf32>
    %52 = arith.mulf %47, %51 : vector<2x32xf32>
    %53 = vector.extract_strided_slice %12 {offsets = [4, 0], sizes = [2, 128], strides = [1, 1]} : vector<16x128xf32> to vector<2x128xf32>
    %cst_22 = arith.constant dense<0.000000e+00> : vector<2x128xf32>
    %54 = tpu.matmul %52, %0, %cst_22 {dimension_numbers = #tpu.dot_dimension_numbers<[1], [0], [0], [1], [0, 0, 1, 1], [], []>} : vector<2x32xf32>, vector<32x128xf32>, vector<2x128xf32> -> vector<2x128xf32>
    %55 = arith.addf %53, %54 : vector<2x128xf32>
    %56 = arith.negf %55 : vector<2x128xf32>
    %57 = math.exp %56 : vector<2x128xf32>
    %cst_23 = arith.constant 1.000000e+00 : f32
    %58 = vector.broadcast %cst_23 : f32 to vector<2x128xf32>
    %59 = arith.addf %58, %57 : vector<2x128xf32>
    %60 = arith.divf %58, %59 : vector<2x128xf32>
    %61 = math.tanh %55 : vector<2x128xf32>
    %62 = vector.extract_strided_slice %60 {offsets = [0, 0], sizes = [2, 32], strides = [1, 1]} : vector<2x128xf32> to vector<2x32xf32>
    %63 = vector.extract_strided_slice %60 {offsets = [0, 32], sizes = [2, 32], strides = [1, 1]} : vector<2x128xf32> to vector<2x32xf32>
    %64 = vector.extract_strided_slice %61 {offsets = [0, 64], sizes = [2, 32], strides = [1, 1]} : vector<2x128xf32> to vector<2x32xf32>
    %65 = vector.extract_strided_slice %60 {offsets = [0, 96], sizes = [2, 32], strides = [1, 1]} : vector<2x128xf32> to vector<2x32xf32>
    %66 = arith.mulf %63, %50 : vector<2x32xf32>
    %67 = arith.mulf %62, %64 : vector<2x32xf32>
    %68 = arith.addf %66, %67 : vector<2x32xf32>
    %69 = math.tanh %68 : vector<2x32xf32>
    %70 = arith.mulf %65, %69 : vector<2x32xf32>
    %71 = vector.extract_strided_slice %12 {offsets = [6, 0], sizes = [2, 128], strides = [1, 1]} : vector<16x128xf32> to vector<2x128xf32>
    %cst_24 = arith.constant dense<0.000000e+00> : vector<2x128xf32>
    %72 = tpu.matmul %70, %0, %cst_24 {dimension_numbers = #tpu.dot_dimension_numbers<[1], [0], [0], [1], [0, 0, 1, 1], [], []>} : vector<2x32xf32>, vector<32x128xf32>, vector<2x128xf32> -> vector<2x128xf32>
    %73 = arith.addf %71, %72 : vector<2x128xf32>
    %74 = arith.negf %73 : vector<2x128xf32>
    %75 = math.exp %74 : vector<2x128xf32>
    %cst_25 = arith.constant 1.000000e+00 : f32
    %76 = vector.broadcast %cst_25 : f32 to vector<2x128xf32>
    %77 = arith.addf %76, %75 : vector<2x128xf32>
    %78 = arith.divf %76, %77 : vector<2x128xf32>
    %79 = math.tanh %73 : vector<2x128xf32>
    %80 = vector.extract_strided_slice %78 {offsets = [0, 0], sizes = [2, 32], strides = [1, 1]} : vector<2x128xf32> to vector<2x32xf32>
    %81 = vector.extract_strided_slice %78 {offsets = [0, 32], sizes = [2, 32], strides = [1, 1]} : vector<2x128xf32> to vector<2x32xf32>
    %82 = vector.extract_strided_slice %79 {offsets = [0, 64], sizes = [2, 32], strides = [1, 1]} : vector<2x128xf32> to vector<2x32xf32>
    %83 = vector.extract_strided_slice %78 {offsets = [0, 96], sizes = [2, 32], strides = [1, 1]} : vector<2x128xf32> to vector<2x32xf32>
    %84 = arith.mulf %81, %68 : vector<2x32xf32>
    %85 = arith.mulf %80, %82 : vector<2x32xf32>
    %86 = arith.addf %84, %85 : vector<2x32xf32>
    %87 = math.tanh %86 : vector<2x32xf32>
    %88 = arith.mulf %83, %87 : vector<2x32xf32>
    %89 = vector.extract_strided_slice %12 {offsets = [8, 0], sizes = [2, 128], strides = [1, 1]} : vector<16x128xf32> to vector<2x128xf32>
    %cst_26 = arith.constant dense<0.000000e+00> : vector<2x128xf32>
    %90 = tpu.matmul %88, %0, %cst_26 {dimension_numbers = #tpu.dot_dimension_numbers<[1], [0], [0], [1], [0, 0, 1, 1], [], []>} : vector<2x32xf32>, vector<32x128xf32>, vector<2x128xf32> -> vector<2x128xf32>
    %91 = arith.addf %89, %90 : vector<2x128xf32>
    %92 = arith.negf %91 : vector<2x128xf32>
    %93 = math.exp %92 : vector<2x128xf32>
    %cst_27 = arith.constant 1.000000e+00 : f32
    %94 = vector.broadcast %cst_27 : f32 to vector<2x128xf32>
    %95 = arith.addf %94, %93 : vector<2x128xf32>
    %96 = arith.divf %94, %95 : vector<2x128xf32>
    %97 = math.tanh %91 : vector<2x128xf32>
    %98 = vector.extract_strided_slice %96 {offsets = [0, 0], sizes = [2, 32], strides = [1, 1]} : vector<2x128xf32> to vector<2x32xf32>
    %99 = vector.extract_strided_slice %96 {offsets = [0, 32], sizes = [2, 32], strides = [1, 1]} : vector<2x128xf32> to vector<2x32xf32>
    %100 = vector.extract_strided_slice %97 {offsets = [0, 64], sizes = [2, 32], strides = [1, 1]} : vector<2x128xf32> to vector<2x32xf32>
    %101 = vector.extract_strided_slice %96 {offsets = [0, 96], sizes = [2, 32], strides = [1, 1]} : vector<2x128xf32> to vector<2x32xf32>
    %102 = arith.mulf %99, %86 : vector<2x32xf32>
    %103 = arith.mulf %98, %100 : vector<2x32xf32>
    %104 = arith.addf %102, %103 : vector<2x32xf32>
    %105 = math.tanh %104 : vector<2x32xf32>
    %106 = arith.mulf %101, %105 : vector<2x32xf32>
    %107 = vector.extract_strided_slice %12 {offsets = [10, 0], sizes = [2, 128], strides = [1, 1]} : vector<16x128xf32> to vector<2x128xf32>
    %cst_28 = arith.constant dense<0.000000e+00> : vector<2x128xf32>
    %108 = tpu.matmul %106, %0, %cst_28 {dimension_numbers = #tpu.dot_dimension_numbers<[1], [0], [0], [1], [0, 0, 1, 1], [], []>} : vector<2x32xf32>, vector<32x128xf32>, vector<2x128xf32> -> vector<2x128xf32>
    %109 = arith.addf %107, %108 : vector<2x128xf32>
    %110 = arith.negf %109 : vector<2x128xf32>
    %111 = math.exp %110 : vector<2x128xf32>
    %cst_29 = arith.constant 1.000000e+00 : f32
    %112 = vector.broadcast %cst_29 : f32 to vector<2x128xf32>
    %113 = arith.addf %112, %111 : vector<2x128xf32>
    %114 = arith.divf %112, %113 : vector<2x128xf32>
    %115 = math.tanh %109 : vector<2x128xf32>
    %116 = vector.extract_strided_slice %114 {offsets = [0, 0], sizes = [2, 32], strides = [1, 1]} : vector<2x128xf32> to vector<2x32xf32>
    %117 = vector.extract_strided_slice %114 {offsets = [0, 32], sizes = [2, 32], strides = [1, 1]} : vector<2x128xf32> to vector<2x32xf32>
    %118 = vector.extract_strided_slice %115 {offsets = [0, 64], sizes = [2, 32], strides = [1, 1]} : vector<2x128xf32> to vector<2x32xf32>
    %119 = vector.extract_strided_slice %114 {offsets = [0, 96], sizes = [2, 32], strides = [1, 1]} : vector<2x128xf32> to vector<2x32xf32>
    %120 = arith.mulf %117, %104 : vector<2x32xf32>
    %121 = arith.mulf %116, %118 : vector<2x32xf32>
    %122 = arith.addf %120, %121 : vector<2x32xf32>
    %123 = math.tanh %122 : vector<2x32xf32>
    %124 = arith.mulf %119, %123 : vector<2x32xf32>
    %125 = vector.extract_strided_slice %12 {offsets = [12, 0], sizes = [2, 128], strides = [1, 1]} : vector<16x128xf32> to vector<2x128xf32>
    %cst_30 = arith.constant dense<0.000000e+00> : vector<2x128xf32>
    %126 = tpu.matmul %124, %0, %cst_30 {dimension_numbers = #tpu.dot_dimension_numbers<[1], [0], [0], [1], [0, 0, 1, 1], [], []>} : vector<2x32xf32>, vector<32x128xf32>, vector<2x128xf32> -> vector<2x128xf32>
    %127 = arith.addf %125, %126 : vector<2x128xf32>
    %128 = arith.negf %127 : vector<2x128xf32>
    %129 = math.exp %128 : vector<2x128xf32>
    %cst_31 = arith.constant 1.000000e+00 : f32
    %130 = vector.broadcast %cst_31 : f32 to vector<2x128xf32>
    %131 = arith.addf %130, %129 : vector<2x128xf32>
    %132 = arith.divf %130, %131 : vector<2x128xf32>
    %133 = math.tanh %127 : vector<2x128xf32>
    %134 = vector.extract_strided_slice %132 {offsets = [0, 0], sizes = [2, 32], strides = [1, 1]} : vector<2x128xf32> to vector<2x32xf32>
    %135 = vector.extract_strided_slice %132 {offsets = [0, 32], sizes = [2, 32], strides = [1, 1]} : vector<2x128xf32> to vector<2x32xf32>
    %136 = vector.extract_strided_slice %133 {offsets = [0, 64], sizes = [2, 32], strides = [1, 1]} : vector<2x128xf32> to vector<2x32xf32>
    %137 = vector.extract_strided_slice %132 {offsets = [0, 96], sizes = [2, 32], strides = [1, 1]} : vector<2x128xf32> to vector<2x32xf32>
    %138 = arith.mulf %135, %122 : vector<2x32xf32>
    %139 = arith.mulf %134, %136 : vector<2x32xf32>
    %140 = arith.addf %138, %139 : vector<2x32xf32>
    %141 = math.tanh %140 : vector<2x32xf32>
    %142 = arith.mulf %137, %141 : vector<2x32xf32>
    %143 = vector.extract_strided_slice %12 {offsets = [14, 0], sizes = [2, 128], strides = [1, 1]} : vector<16x128xf32> to vector<2x128xf32>
    %cst_32 = arith.constant dense<0.000000e+00> : vector<2x128xf32>
    %144 = tpu.matmul %142, %0, %cst_32 {dimension_numbers = #tpu.dot_dimension_numbers<[1], [0], [0], [1], [0, 0, 1, 1], [], []>} : vector<2x32xf32>, vector<32x128xf32>, vector<2x128xf32> -> vector<2x128xf32>
    %145 = arith.addf %143, %144 : vector<2x128xf32>
    %146 = arith.negf %145 : vector<2x128xf32>
    %147 = math.exp %146 : vector<2x128xf32>
    %cst_33 = arith.constant 1.000000e+00 : f32
    %148 = vector.broadcast %cst_33 : f32 to vector<2x128xf32>
    %149 = arith.addf %148, %147 : vector<2x128xf32>
    %150 = arith.divf %148, %149 : vector<2x128xf32>
    %151 = math.tanh %145 : vector<2x128xf32>
    %152 = vector.extract_strided_slice %150 {offsets = [0, 0], sizes = [2, 32], strides = [1, 1]} : vector<2x128xf32> to vector<2x32xf32>
    %153 = vector.extract_strided_slice %150 {offsets = [0, 32], sizes = [2, 32], strides = [1, 1]} : vector<2x128xf32> to vector<2x32xf32>
    %154 = vector.extract_strided_slice %151 {offsets = [0, 64], sizes = [2, 32], strides = [1, 1]} : vector<2x128xf32> to vector<2x32xf32>
    %155 = vector.extract_strided_slice %150 {offsets = [0, 96], sizes = [2, 32], strides = [1, 1]} : vector<2x128xf32> to vector<2x32xf32>
    %156 = arith.mulf %153, %140 : vector<2x32xf32>
    %157 = arith.mulf %152, %154 : vector<2x32xf32>
    %158 = arith.addf %156, %157 : vector<2x32xf32>
    %159 = math.tanh %158 : vector<2x32xf32>
    %160 = arith.mulf %155, %159 : vector<2x32xf32>
    %161 = tpu.concatenate %34, %52, %70, %88, %106, %124, %142, %160 in 0 : vector<2x32xf32>, vector<2x32xf32>, vector<2x32xf32>, vector<2x32xf32>, vector<2x32xf32>, vector<2x32xf32>, vector<2x32xf32>, vector<2x32xf32> -> vector<16x32xf32>
    %c0_34 = arith.constant 0 : index
    %c0_35 = arith.constant 0 : index
    %162 = vector.load %arg7[%c0_34, %c0_35] : memref<32x128xf32, #tpu.memory_space<vmem>>, vector<32x128xf32>
    %cst_36 = arith.constant dense<0.000000e+00> : vector<16x128xf32>
    %163 = tpu.matmul %161, %162, %cst_36 {dimension_numbers = #tpu.dot_dimension_numbers<[1], [0], [0], [1], [0, 0, 1, 1], [], []>} : vector<16x32xf32>, vector<32x128xf32>, vector<16x128xf32> -> vector<16x128xf32>
    %c0_37 = arith.constant 0 : index
    %c0_38 = arith.constant 0 : index
    %164 = vector.load %arg9[%c0_37, %c0_38] : memref<1x128xf32, #tpu.memory_space<vmem>>, vector<1x128xf32>
    %165 = vector.broadcast %164 : vector<1x128xf32> to vector<16x128xf32>
    %166 = arith.addf %163, %165 : vector<16x128xf32>
    %167 = vector.extract_strided_slice %3 {offsets = [1, 0, 0], sizes = [1, 2, 32], strides = [1, 1, 1]} : vector<2x2x32xf32> to vector<1x2x32xf32>
    %168 = vector.shape_cast %167 : vector<1x2x32xf32> to vector<2x32xf32>
    %169 = vector.extract_strided_slice %5 {offsets = [1, 0, 0], sizes = [1, 2, 32], strides = [1, 1, 1]} : vector<2x2x32xf32> to vector<1x2x32xf32>
    %170 = vector.shape_cast %169 : vector<1x2x32xf32> to vector<2x32xf32>
    %171 = vector.extract_strided_slice %166 {offsets = [0, 0], sizes = [2, 128], strides = [1, 1]} : vector<16x128xf32> to vector<2x128xf32>
    %cst_39 = arith.constant dense<0.000000e+00> : vector<2x128xf32>
    %172 = tpu.matmul %168, %1, %cst_39 {dimension_numbers = #tpu.dot_dimension_numbers<[1], [0], [0], [1], [0, 0, 1, 1], [], []>} : vector<2x32xf32>, vector<32x128xf32>, vector<2x128xf32> -> vector<2x128xf32>
    %173 = arith.addf %171, %172 : vector<2x128xf32>
    %174 = arith.negf %173 : vector<2x128xf32>
    %175 = math.exp %174 : vector<2x128xf32>
    %cst_40 = arith.constant 1.000000e+00 : f32
    %176 = vector.broadcast %cst_40 : f32 to vector<2x128xf32>
    %177 = arith.addf %176, %175 : vector<2x128xf32>
    %178 = arith.divf %176, %177 : vector<2x128xf32>
    %179 = math.tanh %173 : vector<2x128xf32>
    %180 = vector.extract_strided_slice %178 {offsets = [0, 0], sizes = [2, 32], strides = [1, 1]} : vector<2x128xf32> to vector<2x32xf32>
    %181 = vector.extract_strided_slice %178 {offsets = [0, 32], sizes = [2, 32], strides = [1, 1]} : vector<2x128xf32> to vector<2x32xf32>
    %182 = vector.extract_strided_slice %179 {offsets = [0, 64], sizes = [2, 32], strides = [1, 1]} : vector<2x128xf32> to vector<2x32xf32>
    %183 = vector.extract_strided_slice %178 {offsets = [0, 96], sizes = [2, 32], strides = [1, 1]} : vector<2x128xf32> to vector<2x32xf32>
    %184 = arith.mulf %181, %170 : vector<2x32xf32>
    %185 = arith.mulf %180, %182 : vector<2x32xf32>
    %186 = arith.addf %184, %185 : vector<2x32xf32>
    %187 = math.tanh %186 : vector<2x32xf32>
    %188 = arith.mulf %183, %187 : vector<2x32xf32>
    %189 = vector.extract_strided_slice %166 {offsets = [2, 0], sizes = [2, 128], strides = [1, 1]} : vector<16x128xf32> to vector<2x128xf32>
    %cst_41 = arith.constant dense<0.000000e+00> : vector<2x128xf32>
    %190 = tpu.matmul %188, %1, %cst_41 {dimension_numbers = #tpu.dot_dimension_numbers<[1], [0], [0], [1], [0, 0, 1, 1], [], []>} : vector<2x32xf32>, vector<32x128xf32>, vector<2x128xf32> -> vector<2x128xf32>
    %191 = arith.addf %189, %190 : vector<2x128xf32>
    %192 = arith.negf %191 : vector<2x128xf32>
    %193 = math.exp %192 : vector<2x128xf32>
    %cst_42 = arith.constant 1.000000e+00 : f32
    %194 = vector.broadcast %cst_42 : f32 to vector<2x128xf32>
    %195 = arith.addf %194, %193 : vector<2x128xf32>
    %196 = arith.divf %194, %195 : vector<2x128xf32>
    %197 = math.tanh %191 : vector<2x128xf32>
    %198 = vector.extract_strided_slice %196 {offsets = [0, 0], sizes = [2, 32], strides = [1, 1]} : vector<2x128xf32> to vector<2x32xf32>
    %199 = vector.extract_strided_slice %196 {offsets = [0, 32], sizes = [2, 32], strides = [1, 1]} : vector<2x128xf32> to vector<2x32xf32>
    %200 = vector.extract_strided_slice %197 {offsets = [0, 64], sizes = [2, 32], strides = [1, 1]} : vector<2x128xf32> to vector<2x32xf32>
    %201 = vector.extract_strided_slice %196 {offsets = [0, 96], sizes = [2, 32], strides = [1, 1]} : vector<2x128xf32> to vector<2x32xf32>
    %202 = arith.mulf %199, %186 : vector<2x32xf32>
    %203 = arith.mulf %198, %200 : vector<2x32xf32>
    %204 = arith.addf %202, %203 : vector<2x32xf32>
    %205 = math.tanh %204 : vector<2x32xf32>
    %206 = arith.mulf %201, %205 : vector<2x32xf32>
    %207 = vector.extract_strided_slice %166 {offsets = [4, 0], sizes = [2, 128], strides = [1, 1]} : vector<16x128xf32> to vector<2x128xf32>
    %cst_43 = arith.constant dense<0.000000e+00> : vector<2x128xf32>
    %208 = tpu.matmul %206, %1, %cst_43 {dimension_numbers = #tpu.dot_dimension_numbers<[1], [0], [0], [1], [0, 0, 1, 1], [], []>} : vector<2x32xf32>, vector<32x128xf32>, vector<2x128xf32> -> vector<2x128xf32>
    %209 = arith.addf %207, %208 : vector<2x128xf32>
    %210 = arith.negf %209 : vector<2x128xf32>
    %211 = math.exp %210 : vector<2x128xf32>
    %cst_44 = arith.constant 1.000000e+00 : f32
    %212 = vector.broadcast %cst_44 : f32 to vector<2x128xf32>
    %213 = arith.addf %212, %211 : vector<2x128xf32>
    %214 = arith.divf %212, %213 : vector<2x128xf32>
    %215 = math.tanh %209 : vector<2x128xf32>
    %216 = vector.extract_strided_slice %214 {offsets = [0, 0], sizes = [2, 32], strides = [1, 1]} : vector<2x128xf32> to vector<2x32xf32>
    %217 = vector.extract_strided_slice %214 {offsets = [0, 32], sizes = [2, 32], strides = [1, 1]} : vector<2x128xf32> to vector<2x32xf32>
    %218 = vector.extract_strided_slice %215 {offsets = [0, 64], sizes = [2, 32], strides = [1, 1]} : vector<2x128xf32> to vector<2x32xf32>
    %219 = vector.extract_strided_slice %214 {offsets = [0, 96], sizes = [2, 32], strides = [1, 1]} : vector<2x128xf32> to vector<2x32xf32>
    %220 = arith.mulf %217, %204 : vector<2x32xf32>
    %221 = arith.mulf %216, %218 : vector<2x32xf32>
    %222 = arith.addf %220, %221 : vector<2x32xf32>
    %223 = math.tanh %222 : vector<2x32xf32>
    %224 = arith.mulf %219, %223 : vector<2x32xf32>
    %225 = vector.extract_strided_slice %166 {offsets = [6, 0], sizes = [2, 128], strides = [1, 1]} : vector<16x128xf32> to vector<2x128xf32>
    %cst_45 = arith.constant dense<0.000000e+00> : vector<2x128xf32>
    %226 = tpu.matmul %224, %1, %cst_45 {dimension_numbers = #tpu.dot_dimension_numbers<[1], [0], [0], [1], [0, 0, 1, 1], [], []>} : vector<2x32xf32>, vector<32x128xf32>, vector<2x128xf32> -> vector<2x128xf32>
    %227 = arith.addf %225, %226 : vector<2x128xf32>
    %228 = arith.negf %227 : vector<2x128xf32>
    %229 = math.exp %228 : vector<2x128xf32>
    %cst_46 = arith.constant 1.000000e+00 : f32
    %230 = vector.broadcast %cst_46 : f32 to vector<2x128xf32>
    %231 = arith.addf %230, %229 : vector<2x128xf32>
    %232 = arith.divf %230, %231 : vector<2x128xf32>
    %233 = math.tanh %227 : vector<2x128xf32>
    %234 = vector.extract_strided_slice %232 {offsets = [0, 0], sizes = [2, 32], strides = [1, 1]} : vector<2x128xf32> to vector<2x32xf32>
    %235 = vector.extract_strided_slice %232 {offsets = [0, 32], sizes = [2, 32], strides = [1, 1]} : vector<2x128xf32> to vector<2x32xf32>
    %236 = vector.extract_strided_slice %233 {offsets = [0, 64], sizes = [2, 32], strides = [1, 1]} : vector<2x128xf32> to vector<2x32xf32>
    %237 = vector.extract_strided_slice %232 {offsets = [0, 96], sizes = [2, 32], strides = [1, 1]} : vector<2x128xf32> to vector<2x32xf32>
    %238 = arith.mulf %235, %222 : vector<2x32xf32>
    %239 = arith.mulf %234, %236 : vector<2x32xf32>
    %240 = arith.addf %238, %239 : vector<2x32xf32>
    %241 = math.tanh %240 : vector<2x32xf32>
    %242 = arith.mulf %237, %241 : vector<2x32xf32>
    %243 = vector.extract_strided_slice %166 {offsets = [8, 0], sizes = [2, 128], strides = [1, 1]} : vector<16x128xf32> to vector<2x128xf32>
    %cst_47 = arith.constant dense<0.000000e+00> : vector<2x128xf32>
    %244 = tpu.matmul %242, %1, %cst_47 {dimension_numbers = #tpu.dot_dimension_numbers<[1], [0], [0], [1], [0, 0, 1, 1], [], []>} : vector<2x32xf32>, vector<32x128xf32>, vector<2x128xf32> -> vector<2x128xf32>
    %245 = arith.addf %243, %244 : vector<2x128xf32>
    %246 = arith.negf %245 : vector<2x128xf32>
    %247 = math.exp %246 : vector<2x128xf32>
    %cst_48 = arith.constant 1.000000e+00 : f32
    %248 = vector.broadcast %cst_48 : f32 to vector<2x128xf32>
    %249 = arith.addf %248, %247 : vector<2x128xf32>
    %250 = arith.divf %248, %249 : vector<2x128xf32>
    %251 = math.tanh %245 : vector<2x128xf32>
    %252 = vector.extract_strided_slice %250 {offsets = [0, 0], sizes = [2, 32], strides = [1, 1]} : vector<2x128xf32> to vector<2x32xf32>
    %253 = vector.extract_strided_slice %250 {offsets = [0, 32], sizes = [2, 32], strides = [1, 1]} : vector<2x128xf32> to vector<2x32xf32>
    %254 = vector.extract_strided_slice %251 {offsets = [0, 64], sizes = [2, 32], strides = [1, 1]} : vector<2x128xf32> to vector<2x32xf32>
    %255 = vector.extract_strided_slice %250 {offsets = [0, 96], sizes = [2, 32], strides = [1, 1]} : vector<2x128xf32> to vector<2x32xf32>
    %256 = arith.mulf %253, %240 : vector<2x32xf32>
    %257 = arith.mulf %252, %254 : vector<2x32xf32>
    %258 = arith.addf %256, %257 : vector<2x32xf32>
    %259 = math.tanh %258 : vector<2x32xf32>
    %260 = arith.mulf %255, %259 : vector<2x32xf32>
    %261 = vector.extract_strided_slice %166 {offsets = [10, 0], sizes = [2, 128], strides = [1, 1]} : vector<16x128xf32> to vector<2x128xf32>
    %cst_49 = arith.constant dense<0.000000e+00> : vector<2x128xf32>
    %262 = tpu.matmul %260, %1, %cst_49 {dimension_numbers = #tpu.dot_dimension_numbers<[1], [0], [0], [1], [0, 0, 1, 1], [], []>} : vector<2x32xf32>, vector<32x128xf32>, vector<2x128xf32> -> vector<2x128xf32>
    %263 = arith.addf %261, %262 : vector<2x128xf32>
    %264 = arith.negf %263 : vector<2x128xf32>
    %265 = math.exp %264 : vector<2x128xf32>
    %cst_50 = arith.constant 1.000000e+00 : f32
    %266 = vector.broadcast %cst_50 : f32 to vector<2x128xf32>
    %267 = arith.addf %266, %265 : vector<2x128xf32>
    %268 = arith.divf %266, %267 : vector<2x128xf32>
    %269 = math.tanh %263 : vector<2x128xf32>
    %270 = vector.extract_strided_slice %268 {offsets = [0, 0], sizes = [2, 32], strides = [1, 1]} : vector<2x128xf32> to vector<2x32xf32>
    %271 = vector.extract_strided_slice %268 {offsets = [0, 32], sizes = [2, 32], strides = [1, 1]} : vector<2x128xf32> to vector<2x32xf32>
    %272 = vector.extract_strided_slice %269 {offsets = [0, 64], sizes = [2, 32], strides = [1, 1]} : vector<2x128xf32> to vector<2x32xf32>
    %273 = vector.extract_strided_slice %268 {offsets = [0, 96], sizes = [2, 32], strides = [1, 1]} : vector<2x128xf32> to vector<2x32xf32>
    %274 = arith.mulf %271, %258 : vector<2x32xf32>
    %275 = arith.mulf %270, %272 : vector<2x32xf32>
    %276 = arith.addf %274, %275 : vector<2x32xf32>
    %277 = math.tanh %276 : vector<2x32xf32>
    %278 = arith.mulf %273, %277 : vector<2x32xf32>
    %279 = vector.extract_strided_slice %166 {offsets = [12, 0], sizes = [2, 128], strides = [1, 1]} : vector<16x128xf32> to vector<2x128xf32>
    %cst_51 = arith.constant dense<0.000000e+00> : vector<2x128xf32>
    %280 = tpu.matmul %278, %1, %cst_51 {dimension_numbers = #tpu.dot_dimension_numbers<[1], [0], [0], [1], [0, 0, 1, 1], [], []>} : vector<2x32xf32>, vector<32x128xf32>, vector<2x128xf32> -> vector<2x128xf32>
    %281 = arith.addf %279, %280 : vector<2x128xf32>
    %282 = arith.negf %281 : vector<2x128xf32>
    %283 = math.exp %282 : vector<2x128xf32>
    %cst_52 = arith.constant 1.000000e+00 : f32
    %284 = vector.broadcast %cst_52 : f32 to vector<2x128xf32>
    %285 = arith.addf %284, %283 : vector<2x128xf32>
    %286 = arith.divf %284, %285 : vector<2x128xf32>
    %287 = math.tanh %281 : vector<2x128xf32>
    %288 = vector.extract_strided_slice %286 {offsets = [0, 0], sizes = [2, 32], strides = [1, 1]} : vector<2x128xf32> to vector<2x32xf32>
    %289 = vector.extract_strided_slice %286 {offsets = [0, 32], sizes = [2, 32], strides = [1, 1]} : vector<2x128xf32> to vector<2x32xf32>
    %290 = vector.extract_strided_slice %287 {offsets = [0, 64], sizes = [2, 32], strides = [1, 1]} : vector<2x128xf32> to vector<2x32xf32>
    %291 = vector.extract_strided_slice %286 {offsets = [0, 96], sizes = [2, 32], strides = [1, 1]} : vector<2x128xf32> to vector<2x32xf32>
    %292 = arith.mulf %289, %276 : vector<2x32xf32>
    %293 = arith.mulf %288, %290 : vector<2x32xf32>
    %294 = arith.addf %292, %293 : vector<2x32xf32>
    %295 = math.tanh %294 : vector<2x32xf32>
    %296 = arith.mulf %291, %295 : vector<2x32xf32>
    %297 = vector.extract_strided_slice %166 {offsets = [14, 0], sizes = [2, 128], strides = [1, 1]} : vector<16x128xf32> to vector<2x128xf32>
    %cst_53 = arith.constant dense<0.000000e+00> : vector<2x128xf32>
    %298 = tpu.matmul %296, %1, %cst_53 {dimension_numbers = #tpu.dot_dimension_numbers<[1], [0], [0], [1], [0, 0, 1, 1], [], []>} : vector<2x32xf32>, vector<32x128xf32>, vector<2x128xf32> -> vector<2x128xf32>
    %299 = arith.addf %297, %298 : vector<2x128xf32>
    %300 = arith.negf %299 : vector<2x128xf32>
    %301 = math.exp %300 : vector<2x128xf32>
    %cst_54 = arith.constant 1.000000e+00 : f32
    %302 = vector.broadcast %cst_54 : f32 to vector<2x128xf32>
    %303 = arith.addf %302, %301 : vector<2x128xf32>
    %304 = arith.divf %302, %303 : vector<2x128xf32>
    %305 = math.tanh %299 : vector<2x128xf32>
    %306 = vector.extract_strided_slice %304 {offsets = [0, 0], sizes = [2, 32], strides = [1, 1]} : vector<2x128xf32> to vector<2x32xf32>
    %307 = vector.extract_strided_slice %304 {offsets = [0, 32], sizes = [2, 32], strides = [1, 1]} : vector<2x128xf32> to vector<2x32xf32>
    %308 = vector.extract_strided_slice %305 {offsets = [0, 64], sizes = [2, 32], strides = [1, 1]} : vector<2x128xf32> to vector<2x32xf32>
    %309 = vector.extract_strided_slice %304 {offsets = [0, 96], sizes = [2, 32], strides = [1, 1]} : vector<2x128xf32> to vector<2x32xf32>
    %310 = arith.mulf %307, %294 : vector<2x32xf32>
    %311 = arith.mulf %306, %308 : vector<2x32xf32>
    %312 = arith.addf %310, %311 : vector<2x32xf32>
    %313 = math.tanh %312 : vector<2x32xf32>
    %314 = arith.mulf %309, %313 : vector<2x32xf32>
    %315 = tpu.concatenate %160, %314 in 0 : vector<2x32xf32>, vector<2x32xf32> -> vector<4x32xf32>
    %cst_55 = arith.constant 0.000000e+00 : f32
    %316 = vector.broadcast %cst_55 : f32 to vector<4x32xf32>
    %317 = tpu.concatenate %315, %316 in 0 : vector<4x32xf32>, vector<4x32xf32> -> vector<8x32xf32>
    %c0_56 = arith.constant 0 : index
    %c0_57 = arith.constant 0 : index
    %318 = vector.load %arg10[%c0_56, %c0_57] : memref<32x128xf32, #tpu.memory_space<vmem>>, vector<32x128xf32>
    %cst_58 = arith.constant dense<0.000000e+00> : vector<8x128xf32>
    %319 = tpu.matmul %317, %318, %cst_58 {dimension_numbers = #tpu.dot_dimension_numbers<[1], [0], [0], [1], [0, 0, 1, 1], [], []>} : vector<8x32xf32>, vector<32x128xf32>, vector<8x128xf32> -> vector<8x128xf32>
    %c0_59 = arith.constant 0 : index
    %c0_60 = arith.constant 0 : index
    %320 = vector.load %arg11[%c0_59, %c0_60] : memref<1x128xf32, #tpu.memory_space<vmem>>, vector<1x128xf32>
    %321 = vector.broadcast %320 : vector<1x128xf32> to vector<8x128xf32>
    %322 = arith.addf %319, %321 : vector<8x128xf32>
    %c0_61 = arith.constant 0 : index
    %c0_62 = arith.constant 0 : index
    %c0_63 = arith.constant 0 : index
    %323 = vector.load %arg12[%c0_61, %c0_62, %c0_63] : memref<1x8x128xf32, #tpu.memory_space<vmem>>, vector<1x8x128xf32>
    %324 = vector.shape_cast %323 : vector<1x8x128xf32> to vector<8x128xf32>
    %325 = vector.shape_cast %322 : vector<8x128xf32> to vector<1x8x128xf32>
    tpu.vector_store %arg12[%c0_61, %c0_62, %c0_63], %325 {strides = array<i32>} : memref<1x8x128xf32, #tpu.memory_space<vmem>>, vector<1x8x128xf32>,
    return
  }
  func.func @transform_0(%arg0: i32) -> (i32, i32, i32) {
    %c0_i32 = arith.constant 0 : i32
    %c0_i32_0 = arith.constant 0 : i32
    %c0_i32_1 = arith.constant 0 : i32
    return %arg0, %c0_i32, %c0_i32_0 : i32, i32, i32
  }
  func.func @transform_1(%arg0: i32) -> (i32, i32, i32, i32) {
    %c0_i32 = arith.constant 0 : i32
    %c0_i32_0 = arith.constant 0 : i32
    %c0_i32_1 = arith.constant 0 : i32
    %c0_i32_2 = arith.constant 0 : i32
    return %arg0, %c0_i32, %c0_i32_0, %c0_i32_1 : i32, i32, i32, i32
  }
  func.func @transform_2(%arg0: i32) -> (i32, i32, i32, i32) {
    %c0_i32 = arith.constant 0 : i32
    %c0_i32_0 = arith.constant 0 : i32
    %c0_i32_1 = arith.constant 0 : i32
    %c0_i32_2 = arith.constant 0 : i32
    return %arg0, %c0_i32, %c0_i32_0, %c0_i32_1 : i32, i32, i32, i32
  }
  func.func @transform_3(%arg0: i32) -> (i32, i32) {
    %c0_i32 = arith.constant 0 : i32
    %c0_i32_0 = arith.constant 0 : i32
    %c0_i32_1 = arith.constant 0 : i32
    return %c0_i32, %c0_i32_0 : i32, i32
  }
  func.func @transform_4(%arg0: i32) -> (i32, i32) {
    %c0_i32 = arith.constant 0 : i32
    %c0_i32_0 = arith.constant 0 : i32
    %c0_i32_1 = arith.constant 0 : i32
    return %c0_i32, %c0_i32_0 : i32, i32
  }
  func.func @transform_5(%arg0: i32) -> (i32, i32) {
    %c0_i32 = arith.constant 0 : i32
    %c0_i32_0 = arith.constant 0 : i32
    %c0_i32_1 = arith.constant 0 : i32
    return %c0_i32, %c0_i32_0 : i32, i32
  }
  func.func @transform_6(%arg0: i32) -> (i32, i32) {
    %c0_i32 = arith.constant 0 : i32
    %c0_i32_0 = arith.constant 0 : i32
    %c0_i32_1 = arith.constant 0 : i32
    return %c0_i32, %c0_i32_0 : i32, i32
  }
  func.func @transform_7(%arg0: i32) -> (i32, i32) {
    %c0_i32 = arith.constant 0 : i32
    %c0_i32_0 = arith.constant 0 : i32
    %c0_i32_1 = arith.constant 0 : i32
    return %c0_i32, %c0_i32_0 : i32, i32
  }
  func.func @transform_8(%arg0: i32) -> (i32, i32) {
    %c0_i32 = arith.constant 0 : i32
    %c0_i32_0 = arith.constant 0 : i32
    %c0_i32_1 = arith.constant 0 : i32
    return %c0_i32, %c0_i32_0 : i32, i32
  }
  func.func @transform_9(%arg0: i32) -> (i32, i32) {
    %c0_i32 = arith.constant 0 : i32
    %c0_i32_0 = arith.constant 0 : i32
    %c0_i32_1 = arith.constant 0 : i32
    return %c0_i32, %c0_i32_0 : i32, i32
  }
  func.func @transform_10(%arg0: i32) -> (i32, i32) {
    %c0_i32 = arith.constant 0 : i32
    %c0_i32_0 = arith.constant 0 : i32
    %c0_i32_1 = arith.constant 0 : i32
    return %c0_i32, %c0_i32_0 : i32, i32
  }
  func.func @transform_11(%arg0: i32) -> (i32, i32, i32) {
    %c0_i32 = arith.constant 0 : i32
    %c0_i32_0 = arith.constant 0 : i32
    %c0_i32_1 = arith.constant 0 : i32
    return %arg0, %c0_i32, %c0_i32_0 : i32, i32, i32
  }
}

</mosaic_0001>

<bundles_post_ra>
// kernel: tpu_custom_call.1
= control target key start
LH: loop header
LB: loop body
LE: loop exit
PB: predicated region body
PF: predicated region fallthrough
CT: control target
= control target key end

     0   :  { %16 = vsyncpa [#allocation3], 0  ;;  %s1998_s0 = inlined_call_operand.vmem [shape: f32[1,16,4], index: 0, kind: input, shape index: {}]   ;;  %s1999_s1 = inlined_call_operand.vmem [shape: f32[1,2,2,32], index: 1, kind: input, shape index: {}]   ;;  %s2000_s2 = inlined_call_operand.vmem [shape: f32[1,2,2,32], index: 2, kind: input, shape index: {}]   ;;  %s2001_s3 = inlined_call_operand.vmem [shape: f32[4,128], index: 3, kind: input, shape index: {}]   ;;  %s2002_s4 = inlined_call_operand.hbm [shape: f32[32,128], index: 4, kind: input, shape index: {}]   ;;  %s2003_s5 = inlined_call_operand.vmem [shape: f32[1,128], index: 5, kind: input, shape index: {}]   ;;  %s2004_s6 = inlined_call_operand.hbm [shape: f32[32,128], index: 6, kind: input, shape index: {}]   ;;  %s2005_s7 = inlined_call_operand.hbm [shape: f32[32,128], index: 7, kind: input, shape index: {}]   ;;  %s2006_s8 = inlined_call_operand.vmem [shape: f32[1,128], index: 8, kind: input, shape index: {}]   ;;  %s2007_s9 = inlined_call_operand.hbm [shape: f32[32,128], index: 9, kind: input, shape index: {}]   ;;  %s2008_s10 = inlined_call_operand.vmem [shape: f32[1,128], index: 10, kind: input, shape index: {}]   ;;  %s2009_s11 = inlined_call_operand.hbm [shape: f32[1,8,128], index: 11, kind: output, shape index: {}]  }
   0x1   :  { %17 = vsyncpa [#allocation6], 0 }
   0x2   :  { %18 = vsyncpa [#allocation9], 0 }
   0x3   :  { %19 = vsyncpa [#allocation4], 0  ;;  %s47_s19 = sshll.u32 %s2004_s6, 4  ;;  %s1672_s20 = smov [#allocation5]   ;;  %s48_s19 = int_to_ptr.hbm [resolvable:$true] %s47_s19 }
   0x4   :  { %s49_s21 = sshll.u32 %s1672_s20, 4  ;;  %s32_s24 = sshll.u32 %s2002_s4, 4  ;;  %s50_s21 = int_to_ptr.vmem [resolvable:$true] %s49_s21  ;;  %s33_s24 = int_to_ptr.hbm [resolvable:$true] %s32_s24 }
   0x5   :  { %s1673_s25 = smov 128   ;;  %s1674_s26 = smov 8  }
   0x6   :  { %55 = dma.hbm_to_vmem [thread:$0]  %s48_s19, 512, %s50_s21, [#allocation6], %s1673_s25, %s1673_s25, %s1674_s26  }
   0x7   :  { %s1675_s27 = smov [#allocation2]   ;;  %s60_s12 = sshll.u32 %s2005_s7, 4  ;;  %s61_s12 = int_to_ptr.hbm [resolvable:$true] %s60_s12 }
   0x8   :  { %s34_s28 = sshll.u32 %s1675_s27, 4  ;;  %s75_s14 = sshll.u32 %s2007_s9, 4  ;;  %s35_s28 = int_to_ptr.vmem [resolvable:$true] %s34_s28  ;;  %s76_s14 = int_to_ptr.hbm [resolvable:$true] %s75_s14 }
   0x9   :  { %40 = dma.hbm_to_vmem [thread:$0]  %s33_s24, 512, %s35_s28, [#allocation3], %s1673_s25, %s1673_s25, %s1674_s26  }
   0xa   :  { %s1676_s15 = smov [#allocation7]   ;;  %s1677_s4 = smov [#allocation8]  }
   0xb   :  { %s62_s16 = sshll.u32 %s1676_s15, 4  ;;  %s77_s17 = sshll.u32 %s1677_s4, 4  ;;  %s63_s16 = int_to_ptr.vmem [resolvable:$true] %s62_s16  ;;  %s78_s17 = int_to_ptr.vmem [resolvable:$true] %s77_s17 }
   0xc   :  { %68 = dma.hbm_to_vmem [thread:$0]  %s61_s12, 512, %s63_s16, [#allocation6], %s1673_s25, %s1673_s25, %s1674_s26  }
   0xd   :  { %83 = dma.hbm_to_vmem [thread:$0]  %s76_s14, 512, %s78_s17, [#allocation9], %s1673_s25, %s1673_s25, %s1674_s26  }
   0xe   :  { %1664 = dma.done.wait [#allocation3], 512  }
   0xf   :  { %1665 = vsyncadd [#allocation3], 4294966784 }
  0x10   :  { %1666 = dma.done.wait [#allocation6], 1024  }
  0x11   :  { %1667 = vsyncadd [#allocation6], 4294966272 }
  0x12   :  { %1668 = dma.done.wait [#allocation9], 512  }
  0x13   :  { %1669 = vsyncadd [#allocation9], 4294966784  ;;  %vm128_vm0 = vcmask 1043456   ;;  %vm121_vm1 = vcmask 31744   ;;  %v105_v0 = vld [vmem:[#allocation2 + $0x18] sm:$0xff]  ;;  %v104_v1 = vld [vmem:[#allocation2 + $0x10] sm:$0xff] }
  0x14   :  { %v116_v2 = vld [vmem:[%s2001_s3] sm:$0xf]  ;;  %171 = vmatpush.msra.mxu1 %v105_v0  ;;  %v103_v4 = vld [vmem:[#allocation2 + $0x8] sm:$0xff]  ;;  %238 = vmatpush.msra.mxu2 %v105_v0  ;;  %vm155_vm2 = vcmask 261120   ;;  %s1678_s23 = smov 64   ;;  %s1679_s26 = smov 32  }
  0x15   :  { %1366 = vmatpush.msk.msra.mxu0 %vm128_vm0, %v116_v2  ;;  %v114_v3 = vld [vmem:[%s1998_s0] sm:$0xff]  ;;  %308 = vmatpush.msra.mxu3 %v105_v0  ;;  %vm706_vm15 = vcmask 1041408   ;;  %s1680_s6 = smov [#allocation10]   ;;  %s1354_s16 = sshll.u32 %s2009_s11, 4  ;;  %s1355_s16 = int_to_ptr.hbm [resolvable:$true] %s1354_s16 }
  0x16   :  { %1367 = vmatmul.msk.f32.vlgmr.msra.gmra.mxu0 %vm121_vm1, %v114_v3  ;;  %172 = vmatpush.msra.mxu1 %v104_v1  ;;  %v102_v5 = vld [vmem:[#allocation2] sm:$0xff]  ;;  %s1352_s13 = sshll.u32 %s1680_s6, 4  ;;  %s1353_s13 = int_to_ptr.vmem [resolvable:$true] %s1352_s13 }
  0x17   :  { %239 = vmatpush.msra.mxu2 %v104_v1  ;;  %584 = vmatpush.msrb.mxu0 %v105_v0  ;;  %v110_v6 = vld [vmem:[%s1999_s1] sm:$0x3] }
  0x18   :  { %173 = vmatpush.msra.mxu1 %v103_v4  ;;  %309 = vmatpush.msra.mxu3 %v104_v1  ;;  %v1768_v7 = vld [vmem:[%s2003_s5] ss:$0 sm:$0xff] }
  0x19   :  { %240 = vmatpush.msra.mxu2 %v103_v4  ;;  %585 = vmatpush.msrb.mxu0 %v104_v1  ;;  %v112_v13 = vld [vmem:[%s2000_s2] sm:$0x3] }
  0x1a   :  { %174 = vmatpush.msra.mxu1 %v102_v5  ;;  %310 = vmatpush.msra.mxu3 %v103_v4 }
  0x1b   :  { %1369 = vmatmul.msk.f32.vlgmr.msra.gmra.mxu1 %vm155_vm2, %v110_v6  ;;  %241 = vmatpush.msra.mxu2 %v102_v5 }
  0x1c   :  { %311 = vmatpush.msra.mxu3 %v102_v5  ;;  %378 = vmatpush.msrb.mxu1 %v105_v0 }
  0x1d   :  { %448 = vmatpush.msrb.mxu2 %v105_v0  ;;  %586 = vmatpush.msrb.mxu0 %v103_v4 }
  0x1e   :  { %514 = vmatpush.msrb.mxu3 %v105_v0  ;;  %379 = vmatpush.msrb.mxu1 %v104_v1 }
  0x1f   :  { %449 = vmatpush.msrb.mxu2 %v104_v1  ;;  %587 = vmatpush.msrb.mxu0 %v102_v5 }
  0x20   :  { %515 = vmatpush.msrb.mxu3 %v104_v1  ;;  %380 = vmatpush.msrb.mxu1 %v103_v4 }
  0x21   :  { %450 = vmatpush.msrb.mxu2 %v103_v4 }
  0x22   :  { %516 = vmatpush.msrb.mxu3 %v103_v4  ;;  %381 = vmatpush.msrb.mxu1 %v102_v5 }
  0x23   :  { %451 = vmatpush.msrb.mxu2 %v102_v5 }
  0x24   :  { %517 = vmatpush.msrb.mxu3 %v102_v5  ;;  %654 = vmatpush.msra.mxu1 %v105_v0 }
  0x26   :  { %655 = vmatpush.msra.mxu1 %v104_v1 }
  0x28   :  { %656 = vmatpush.msra.mxu1 %v103_v4 }
  0x2a   :  { %657 = vmatpush.msra.mxu1 %v102_v5 }
  0x93   :  { %v149_v8 = vpop.f32.mrf.mxu0 }
  0x94   :  { %v1771_v9 = vadd.f32 %v1768_v7, %v149_v8 }
  0x98   :  { %v176_v10 = vpop.f32.mrf.mxu1 }
  0x99   :  { %v179_v11 = vadd.f32 %v176_v10, %v1771_v9 }
  0x9b   :  { %1416 = vtanh.f32 %v179_v11  ;;  %v1370_v14 = vmul.f32 -1.442695, %v179_v11 }
  0x9d   :  { %1418 = vpow2.f32 %v1370_v14 }
  0xa1   :  { %v1417_v12 = vpop.eup %1416 }
  0xa2   :  { %206 = vrot.lane.b32.xlu0 %v1417_v12, %s1678_s23 }
  0xa3   :  { %v1419_v15 = vpop.eup %1418 }
  0xa4   :  { %v183_v16 = vadd.f32 1.0, %v1419_v15 }
  0xa6   :  { %1420 = vrcp.f32 %v183_v16  ;;  %v195_v22 = vand.u32 2147483648, %v183_v16  ;;  %vm189_vm4 = vweird.f32 %v183_v16  ;;  %v193_v23 = vand.u32 2147483647, %v183_v16 }
  0xa8   :  { %v196_v25 = vor.u32 1.1754944e-38, %v195_v22  ;;  %vm194_vm6 = vcmp.eq.f32.partialorder %v193_v23, 8.507059e+37 }
  0xaa   :  { %201 = vrot.lane.b32.xlu0 %v112_v13, %s1679_s26 }
  0xac   :  { %v1421_v17 = vpop.eup %1420 }
  0xad   :  { %v185_v18 = vmul.f32 %v1421_v17, %v183_v16  ;;  %vm190_vm3 = vweird.f32 %v1421_v17 }
  0xae   :  { %vm191_vm5 = vmor %vm189_vm4, %vm190_vm3 }
  0xaf   :  { %v186_v19 = vsub.f32 1.0, %v185_v18 }
  0xb1   :  { %v187_v20 = vmul.f32 %v1421_v17, %v186_v19 }
  0xb3   :  { %v188_v21 = vadd.f32 %v1421_v17, %v187_v20 }
  0xb5   :  { %v192_v24 = vsel %vm191_vm5, %v1421_v17, %v188_v21 }
  0xb6   :  { %v197_v27 = vsel %vm194_vm6, %v196_v25, %v192_v24 }
 0x114   :  { %v207_v26 = vpop.permute.xlu0 %206 }
 0x115   :  { %v209_v28 = vmul.f32 %v207_v26, %v197_v27 }
 0x117   :  { %211 = vrot.lane.b32.xlu1 %v209_v28, %s1679_s26 }
 0x11c   :  { %v202_v29 = vpop.permute.xlu0 %201 }
 0x11d   :  { %v204_v30 = vmul.f32 %v202_v29, %v197_v27 }
 0x189   :  { %v212_v31 = vpop.permute.xlu1 %211 }
 0x18a   :  { %v214_v32 = vadd.f32 %v212_v31, %v204_v30 }
 0x18c   :  { %1422 = vtanh.f32 %v214_v32  ;;  %v271_v56 = vrot.slane %v214_v32, 6 }
 0x192   :  { %v1423_v33 = vpop.eup %1422 }
 0x193   :  { %217 = vrot.lane.b32.xlu1 %v1423_v33, %s1678_s23 }
 0x205   :  { %v218_v34 = vpop.permute.xlu1 %217 }
 0x206   :  { %v1781_v35 = vmul.f32 %v218_v34, %v197_v27 }
 0x208   :  { %222 = vrot.lane.b32.xlu2 %v1781_v35, %s1679_s26 }
 0x262   :  { %v223_v36 = vpop.permute.xlu2 %222 }
 0x263   :  { %1371 = vmatmul.msk.f32.vlgmr.msra.gmra.mxu2 %vm155_vm2, %v223_v36 }
 0x2e6   :  { %v243_v37 = vpop.f32.mrf.mxu2 }
 0x2e7   :  { %v247_v38 = vrot.slane %v243_v37, 6 }
 0x2e9   :  { %v249_v39 = vadd.f32 %v247_v38, %v1771_v9 }
 0x2eb   :  { %1424 = vtanh.f32 %v249_v39  ;;  %v1372_v41 = vmul.f32 -1.442695, %v249_v39 }
 0x2ed   :  { %1426 = vpow2.f32 %v1372_v41 }
 0x2f1   :  { %v1425_v40 = vpop.eup %1424 }
 0x2f2   :  { %275 = vrot.lane.b32.xlu2 %v1425_v40, %s1678_s23 }
 0x2f3   :  { %v1427_v42 = vpop.eup %1426 }
 0x2f4   :  { %v253_v43 = vadd.f32 1.0, %v1427_v42 }
 0x2f6   :  { %1428 = vrcp.f32 %v253_v43  ;;  %v265_v49 = vand.u32 2147483648, %v253_v43  ;;  %vm259_vm8 = vweird.f32 %v253_v43  ;;  %v263_v50 = vand.u32 2147483647, %v253_v43 }
 0x2f8   :  { %v266_v52 = vor.u32 1.1754944e-38, %v265_v49  ;;  %vm264_vm10 = vcmp.eq.f32.partialorder %v263_v50, 8.507059e+37 }
 0x2fc   :  { %v1429_v44 = vpop.eup %1428 }
 0x2fd   :  { %v255_v45 = vmul.f32 %v1429_v44, %v253_v43  ;;  %vm260_vm7 = vweird.f32 %v1429_v44 }
 0x2fe   :  { %vm261_vm9 = vmor %vm259_vm8, %vm260_vm7  ;;  %vm709_vm7 = vcmask 1045504  }
 0x2ff   :  { %v256_v46 = vsub.f32 1.0, %v255_v45 }
 0x301   :  { %v257_v47 = vmul.f32 %v1429_v44, %v256_v46 }
 0x303   :  { %v258_v48 = vadd.f32 %v1429_v44, %v257_v47 }
 0x305   :  { %v262_v51 = vsel %vm261_vm9, %v1429_v44, %v258_v48 }
 0x306   :  { %v267_v54 = vsel %vm264_vm10, %v266_v52, %v262_v51 }
 0x307   :  { %v273_v57 = vmul.f32 %v271_v56, %v267_v54 }
 0x34c   :  { %v276_v53 = vpop.permute.xlu2 %275 }
 0x34d   :  { %v278_v55 = vmul.f32 %v276_v53, %v267_v54 }
 0x34f   :  { %280 = vrot.lane.b32.xlu0 %v278_v55, %s1679_s26 }
 0x3c1   :  { %v281_v58 = vpop.permute.xlu0 %280 }
 0x3c2   :  { %v283_v59 = vadd.f32 %v281_v58, %v273_v57 }
 0x3c4   :  { %1430 = vtanh.f32 %v283_v59  ;;  %v341_v22 = vrot.slane %v283_v59, 6 }
 0x3ca   :  { %v1431_v60 = vpop.eup %1430 }
 0x3cb   :  { %286 = vrot.lane.b32.xlu1 %v1431_v60, %s1678_s23  ;;  %v115_v60 = vld [vmem:[%s1998_s0 + $0x8] sm:$0xff] }
 0x3cc   :  { %1368 = vmatmul.msk.f32.gmra.mxu0 %vm121_vm1, %v115_v60 }
 0x43d   :  { %v287_v61 = vpop.permute.xlu1 %286 }
 0x43e   :  { %v289_v62 = vmul.f32 %v287_v61, %v267_v54 }
 0x440   :  { %v291_v63 = vrot.slane %v289_v62, 2  ;;  %v707_v29 = vsel %vm706_vm15, %v1781_v35, %v289_v62 }
 0x442   :  { %292 = vrot.lane.b32.xlu2 %v291_v63, %s1679_s26 }
 0x449   :  { %v152_v62 = vpop.f32.mrf.mxu0 }
 0x44a   :  { %v1813_v63 = vadd.f32 %v1768_v7, %v152_v62 }
 0x49c   :  { %v293_v0 = vpop.permute.xlu2 %292 }
 0x49d   :  { %1373 = vmatmul.msk.f32.vlgmr.msra.gmra.mxu3 %vm155_vm2, %v293_v0 }
 0x520   :  { %v313_v1 = vpop.f32.mrf.mxu3 }
 0x521   :  { %v317_v2 = vrot.slane %v313_v1, 4 }
 0x523   :  { %v319_v3 = vadd.f32 %v317_v2, %v1771_v9 }
 0x525   :  { %1432 = vtanh.f32 %v319_v3  ;;  %v1374_v5 = vmul.f32 -1.442695, %v319_v3 }
 0x527   :  { %1434 = vpow2.f32 %v1374_v5 }
 0x52b   :  { %v1433_v4 = vpop.eup %1432 }
 0x52c   :  { %345 = vrot.lane.b32.xlu0 %v1433_v4, %s1678_s23 }
 0x52d   :  { %v1435_v6 = vpop.eup %1434 }
 0x52e   :  { %v323_v8 = vadd.f32 1.0, %v1435_v6 }
 0x530   :  { %1436 = vrcp.f32 %v323_v8  ;;  %v335_v15 = vand.u32 2147483648, %v323_v8  ;;  %vm329_vm12 = vweird.f32 %v323_v8  ;;  %v333_v16 = vand.u32 2147483647, %v323_v8 }
 0x532   :  { %v336_v18 = vor.u32 1.1754944e-38, %v335_v15  ;;  %vm334_vm14 = vcmp.eq.f32.partialorder %v333_v16, 8.507059e+37 }
 0x536   :  { %v1437_v10 = vpop.eup %1436 }
 0x537   :  { %v325_v11 = vmul.f32 %v1437_v10, %v323_v8  ;;  %vm330_vm11 = vweird.f32 %v1437_v10 }
 0x538   :  { %vm331_vm13 = vmor %vm329_vm12, %vm330_vm11 }
 0x539   :  { %v326_v12 = vsub.f32 1.0, %v325_v11 }
 0x53b   :  { %v327_v13 = vmul.f32 %v1437_v10, %v326_v12 }
 0x53d   :  { %v328_v14 = vadd.f32 %v1437_v10, %v327_v13 }
 0x53f   :  { %v332_v17 = vsel %vm331_vm13, %v1437_v10, %v328_v14 }
 0x540   :  { %v337_v20 = vsel %vm334_vm14, %v336_v18, %v332_v17 }
 0x541   :  { %v343_v23 = vmul.f32 %v341_v22, %v337_v20  ;;  %v714_v22 = vld [vmem:[#allocation5] sm:$0xff] }
 0x59e   :  { %v346_v19 = vpop.permute.xlu0 %345 }
 0x59f   :  { %v348_v21 = vmul.f32 %v346_v19, %v337_v20  ;;  %v717_v19 = vld [vmem:[#allocation5 + $0x18] sm:$0xff] }
 0x5a0   :  { %744 = vmatpush.msra.mxu2 %v717_v19 }
 0x5a1   :  { %350 = vrot.lane.b32.xlu1 %v348_v21, %s1679_s26  ;;  %v715_v21 = vld [vmem:[#allocation5 + $0x8] sm:$0xff] }
 0x613   :  { %v351_v24 = vpop.permute.xlu1 %350 }
 0x614   :  { %v353_v25 = vadd.f32 %v351_v24, %v343_v23 }
 0x616   :  { %1438 = vtanh.f32 %v353_v25  ;;  %v411_v51 = vrot.slane %v353_v25, 6 }
 0x61c   :  { %v1439_v26 = vpop.eup %1438 }
 0x61d   :  { %356 = vrot.lane.b32.xlu2 %v1439_v26, %s1678_s23 }
 0x677   :  { %v357_v27 = vpop.permute.xlu2 %356 }
 0x678   :  { %v359_v28 = vmul.f32 %v357_v27, %v337_v20  ;;  %v716_v20 = vld [vmem:[#allocation5 + $0x10] sm:$0xff] }
 0x679   :  { %745 = vmatpush.msra.mxu2 %v716_v20 }
 0x67a   :  { %v361_v30 = vrot.slane %v359_v28, 4  ;;  %v708_v31 = vsel %vm128_vm0, %v707_v29, %v359_v28 }
 0x67b   :  { %746 = vmatpush.msra.mxu2 %v715_v21 }
 0x67c   :  { %362 = vrot.lane.b32.xlu0 %v361_v30, %s1679_s26 }
 0x67d   :  { %747 = vmatpush.msra.mxu2 %v714_v22 }
 0x6ee   :  { %v363_v32 = vpop.permute.xlu0 %362 }
 0x6ef   :  { %1375 = vmatmul.msk.f32.vlgmr.msrb.gmra.mxu1 %vm155_vm2, %v363_v32  ;;  %v1830_v32 = vld [vmem:[#allocation7 + $0x10] sm:$0xff] }
 0x76c   :  { %v383_v33 = vpop.f32.mrf.mxu1 }
 0x76d   :  { %v387_v34 = vrot.slane %v383_v33, 2  ;;  %v1834_v33 = vld [vmem:[#allocation7 + $0x8] sm:$0xff] }
 0x76f   :  { %v389_v36 = vadd.f32 %v387_v34, %v1771_v9  ;;  %v1840_v34 = vld [vmem:[#allocation7] sm:$0xff] }
 0x771   :  { %1440 = vtanh.f32 %v389_v36  ;;  %v1376_v38 = vmul.f32 -1.442695, %v389_v36 }
 0x773   :  { %1442 = vpow2.f32 %v1376_v38 }
 0x777   :  { %v1441_v37 = vpop.eup %1440 }
 0x778   :  { %415 = vrot.lane.b32.xlu1 %v1441_v37, %s1678_s23  ;;  %v111_v37 = vld [vmem:[%s1999_s1 + $0x2] sm:$0x3] }
 0x779   :  { %v1443_v39 = vpop.eup %1442 }
 0x77a   :  { %v393_v35 = vadd.f32 1.0, %v1443_v39 }
 0x77c   :  { %1444 = vrcp.f32 %v393_v35  ;;  %v405_v45 = vand.u32 2147483648, %v393_v35  ;;  %vm399_vm4 = vweird.f32 %v393_v35  ;;  %v403_v46 = vand.u32 2147483647, %v393_v35 }
 0x77e   :  { %v406_v47 = vor.u32 1.1754944e-38, %v405_v45  ;;  %vm404_vm6 = vcmp.eq.f32.partialorder %v403_v46, 8.507059e+37 }
 0x782   :  { %v1445_v40 = vpop.eup %1444 }
 0x783   :  { %v395_v41 = vmul.f32 %v1445_v40, %v393_v35  ;;  %vm400_vm3 = vweird.f32 %v1445_v40  ;;  %v1868_v35 = vld [vmem:[%s2006_s8] ss:$0 sm:$0xff] }
 0x784   :  { %vm401_vm5 = vmor %vm399_vm4, %vm400_vm3 }
 0x785   :  { %v396_v42 = vsub.f32 1.0, %v395_v41 }
 0x787   :  { %v397_v43 = vmul.f32 %v1445_v40, %v396_v42 }
 0x789   :  { %v398_v44 = vadd.f32 %v1445_v40, %v397_v43 }
 0x78b   :  { %v402_v9 = vsel %vm401_vm5, %v1445_v40, %v398_v44 }
 0x78c   :  { %v407_v49 = vsel %vm404_vm6, %v406_v47, %v402_v9  ;;  %v113_v9 = vld [vmem:[%s2000_s2 + $0x2] sm:$0x3] }
 0x78d   :  { %v413_v52 = vmul.f32 %v411_v51, %v407_v49 }
 0x7ea   :  { %v416_v48 = vpop.permute.xlu1 %415 }
 0x7eb   :  { %v418_v50 = vmul.f32 %v416_v48, %v407_v49 }
 0x7ed   :  { %420 = vrot.lane.b32.xlu2 %v418_v50, %s1679_s26 }
 0x847   :  { %v421_v53 = vpop.permute.xlu2 %420 }
 0x848   :  { %v423_v54 = vadd.f32 %v421_v53, %v413_v52 }
 0x84a   :  { %1446 = vtanh.f32 %v423_v54  ;;  %v478_v23 = vrot.slane %v423_v54, 6 }
 0x850   :  { %v1447_v55 = vpop.eup %1446 }
 0x851   :  { %426 = vrot.lane.b32.xlu0 %v1447_v55, %s1678_s23 }
 0x8c3   :  { %v427_v56 = vpop.permute.xlu0 %426 }
 0x8c4   :  { %v429_v57 = vmul.f32 %v427_v56, %v407_v49 }
 0x8c6   :  { %v431_v58 = vrot.slane %v429_v57, 6  ;;  %v710_v59 = vsel %vm709_vm7, %v708_v31, %v429_v57  ;;  %v1828_v31 = vld [vmem:[#allocation7 + $0x18] sm:$0xff] }
 0x8c7   :  { %770 = vmatpush.msra.mxu3 %v1828_v31  ;;  %837 = vmatpush.msra.mxu0 %v1828_v31 }
 0x8c8   :  { %432 = vrot.lane.b32.xlu1 %v431_v58, %s1679_s26  ;;  %907 = vmatpush.msrb.mxu1 %v1828_v31 }
 0x8c9   :  { %771 = vmatpush.msra.mxu3 %v1830_v32  ;;  %838 = vmatpush.msra.mxu0 %v1830_v32 }
 0x8ca   :  { %908 = vmatpush.msrb.mxu1 %v1830_v32 }
 0x8cb   :  { %772 = vmatpush.msra.mxu3 %v1834_v33  ;;  %839 = vmatpush.msra.mxu0 %v1834_v33 }
 0x8cc   :  { %909 = vmatpush.msrb.mxu1 %v1834_v33 }
 0x8cd   :  { %773 = vmatpush.msra.mxu3 %v1840_v34  ;;  %840 = vmatpush.msra.mxu0 %v1840_v34 }
 0x8ce   :  { %910 = vmatpush.msrb.mxu1 %v1840_v34 }
 0x93a   :  { %v433_v61 = vpop.permute.xlu1 %432 }
 0x93b   :  { %1377 = vmatmul.msk.f32.vlgmr.msrb.gmra.mxu2 %vm155_vm2, %v433_v61 }
 0x93c   :  { %1183 = vmatpush.msrb.mxu2 %v1828_v31 }
 0x93e   :  { %1184 = vmatpush.msrb.mxu2 %v1830_v32 }
 0x940   :  { %1185 = vmatpush.msrb.mxu2 %v1834_v33 }
 0x942   :  { %1186 = vmatpush.msrb.mxu2 %v1840_v34 }
 0x9be   :  { %v453_v0 = vpop.f32.mrf.mxu2 }
 0x9bf   :  { %v456_v1 = vadd.f32 %v453_v0, %v1813_v63 }
 0x9c1   :  { %1448 = vtanh.f32 %v456_v1  ;;  %v1378_v3 = vmul.f32 -1.442695, %v456_v1 }
 0x9c3   :  { %1450 = vpow2.f32 %v1378_v3 }
 0x9c7   :  { %v1449_v2 = vpop.eup %1448 }
 0x9c8   :  { %482 = vrot.lane.b32.xlu2 %v1449_v2, %s1678_s23 }
 0x9c9   :  { %v1451_v4 = vpop.eup %1450 }
 0x9ca   :  { %v460_v5 = vadd.f32 1.0, %v1451_v4 }
 0x9cc   :  { %1452 = vrcp.f32 %v460_v5  ;;  %v472_v7 = vand.u32 2147483648, %v460_v5  ;;  %vm466_vm8 = vweird.f32 %v460_v5  ;;  %v470_v13 = vand.u32 2147483647, %v460_v5 }
 0x9ce   :  { %v473_v15 = vor.u32 1.1754944e-38, %v472_v7  ;;  %vm471_vm10 = vcmp.eq.f32.partialorder %v470_v13, 8.507059e+37 }
 0x9d2   :  { %v1453_v6 = vpop.eup %1452 }
 0x9d3   :  { %v462_v8 = vmul.f32 %v1453_v6, %v460_v5  ;;  %vm467_vm1 = vweird.f32 %v1453_v6 }
 0x9d4   :  { %vm468_vm9 = vmor %vm466_vm8, %vm467_vm1 }
 0x9d5   :  { %v463_v10 = vsub.f32 1.0, %v462_v8 }
 0x9d7   :  { %v464_v11 = vmul.f32 %v1453_v6, %v463_v10 }
 0x9d9   :  { %v465_v12 = vadd.f32 %v1453_v6, %v464_v11 }
 0x9db   :  { %v469_v14 = vsel %vm468_vm9, %v1453_v6, %v465_v12 }
 0x9dc   :  { %v474_v17 = vsel %vm471_vm10, %v473_v15, %v469_v14 }
 0x9dd   :  { %v480_v24 = vmul.f32 %v478_v23, %v474_v17 }
 0xa22   :  { %v483_v16 = vpop.permute.xlu2 %482 }
 0xa23   :  { %v485_v18 = vmul.f32 %v483_v16, %v474_v17 }
 0xa25   :  { %487 = vrot.lane.b32.xlu0 %v485_v18, %s1679_s26 }
 0xa2d   :  { %724 = vrot.lane.b32.xlu0 %v710_v59, %s1679_s26 }
 0xa97   :  { %v488_v25 = vpop.permute.xlu0 %487 }
 0xa98   :  { %v1819_v26 = vadd.f32 %v488_v25, %v480_v24 }
 0xa9a   :  { %1454 = vtanh.f32 %v1819_v26  ;;  %v547_v20 = vrot.slane %v1819_v26, 6 }
 0xa9f   :  { %v725_v27 = vpop.permute.xlu0 %724 }
 0xaa0   :  { %v1455_v28 = vpop.eup %1454  ;;  %1385 = vmatmul.msk.f32.vlgmr.msra.gmra.mxu2 %vm155_vm2, %v725_v27 }
 0xaa1   :  { %493 = vrot.lane.b32.xlu1 %v1455_v28, %s1678_s23 }
 0xb13   :  { %v494_v29 = vpop.permute.xlu1 %493 }
 0xb14   :  { %v1824_v30 = vmul.f32 %v494_v29, %v474_v17 }
 0xb16   :  { %498 = vrot.lane.b32.xlu2 %v1824_v30, %s1679_s26 }
 0xb23   :  { %v749_v41 = vpop.f32.mrf.mxu2 }
 0xb24   :  { %v1872_v42 = vadd.f32 %v1868_v35, %v749_v41 }
 0xb70   :  { %v499_v36 = vpop.permute.xlu2 %498 }
 0xb71   :  { %1379 = vmatmul.msk.f32.vlgmr.msrb.gmra.mxu3 %vm155_vm2, %v499_v36 }
 0xb72   :  { %977 = vmatpush.msrb.mxu3 %v1828_v31 }
 0xb74   :  { %978 = vmatpush.msrb.mxu3 %v1830_v32 }
 0xb76   :  { %979 = vmatpush.msrb.mxu3 %v1834_v33 }
 0xb78   :  { %980 = vmatpush.msrb.mxu3 %v1840_v34 }
 0xb79   :  { %1387 = vmatmul.msk.f32.vlgmr.msra.gmra.mxu3 %vm155_vm2, %v111_v37 }
 0xb7a   :  { %1253 = vmatpush.msra.mxu3 %v1828_v31 }
 0xb7c   :  { %1254 = vmatpush.msra.mxu3 %v1830_v32 }
 0xb7e   :  { %1255 = vmatpush.msra.mxu3 %v1834_v33 }
 0xb80   :  { %1256 = vmatpush.msra.mxu3 %v1840_v34 }
 0xbf4   :  { %v519_v38 = vpop.f32.mrf.mxu3 }
 0xbf5   :  { %v523_v39 = vrot.slane %v519_v38, 6 }
 0xbf7   :  { %v525_v40 = vadd.f32 %v523_v39, %v1813_v63 }
 0xbf9   :  { %1456 = vtanh.f32 %v525_v40  ;;  %v1380_v50 = vmul.f32 -1.442695, %v525_v40 }
 0xbfc   :  { %v775_v43 = vpop.f32.mrf.mxu3 }
 0xbfd   :  { %v778_v44 = vadd.f32 %v775_v43, %v1872_v42 }
 0xbff   :  { %v1457_v45 = vpop.eup %1456  ;;  %1458 = vtanh.f32 %v778_v44  ;;  %v1388_v47 = vmul.f32 -1.442695, %v778_v44 }
 0xc00   :  { %551 = vrot.lane.b32.xlu1 %v1457_v45, %s1678_s23 }
 0xc01   :  { %1460 = vpow2.f32 %v1388_v47 }
 0xc05   :  { %v1459_v46 = vpop.eup %1458 }
 0xc06   :  { %805 = vrot.lane.b32.xlu2 %v1459_v46, %s1678_s23 }
 0xc07   :  { %v1461_v48 = vpop.eup %1460 }
 0xc08   :  { %800 = vrot.lane.b32.xlu1 %v113_v9, %s1679_s26  ;;  %v782_v49 = vadd.f32 1.0, %v1461_v48 }
 0xc0a   :  { %1462 = vrcp.f32 %v782_v49  ;;  %v794_v58 = vand.u32 2147483648, %v782_v49  ;;  %vm788_vm12 = vweird.f32 %v782_v49  ;;  %v792_v59 = vand.u32 2147483647, %v782_v49 }
 0xc0b   :  { %1464 = vpow2.f32 %v1380_v50 }
 0xc0c   :  { %v795_v62 = vor.u32 1.1754944e-38, %v794_v58  ;;  %vm793_vm14 = vcmp.eq.f32.partialorder %v792_v59, 8.507059e+37 }
 0xc10   :  { %v1463_v51 = vpop.eup %1462 }
 0xc11   :  { %v784_v52 = vmul.f32 %v1463_v51, %v782_v49  ;;  %v1465_v53 = vpop.eup %1464  ;;  %vm789_vm11 = vweird.f32 %v1463_v51 }
 0xc12   :  { %v529_v55 = vadd.f32 1.0, %v1465_v53  ;;  %vm790_vm13 = vmor %vm788_vm12, %vm789_vm11 }
 0xc13   :  { %v785_v54 = vsub.f32 1.0, %v784_v52 }
 0xc14   :  { %1466 = vrcp.f32 %v529_v55  ;;  %v541_v8 = vand.u32 2147483648, %v529_v55  ;;  %vm535_vm4 = vweird.f32 %v529_v55  ;;  %v539_v10 = vand.u32 2147483647, %v529_v55 }
 0xc15   :  { %v786_v56 = vmul.f32 %v1463_v51, %v785_v54 }
 0xc16   :  { %v542_v12 = vor.u32 1.1754944e-38, %v541_v8  ;;  %vm540_vm6 = vcmp.eq.f32.partialorder %v539_v10, 8.507059e+37 }
 0xc17   :  { %v787_v57 = vadd.f32 %v1463_v51, %v786_v56 }
 0xc19   :  { %v791_v61 = vsel %vm790_vm13, %v1463_v51, %v787_v57 }
 0xc1a   :  { %v1467_v60 = vpop.eup %1466  ;;  %v796_v2 = vsel %vm793_vm14, %v795_v62, %v791_v61 }
 0xc1b   :  { %v531_v0 = vmul.f32 %v1467_v60, %v529_v55  ;;  %vm536_vm3 = vweird.f32 %v1467_v60 }
 0xc1c   :  { %vm537_vm5 = vmor %vm535_vm4, %vm536_vm3 }
 0xc1d   :  { %v532_v4 = vsub.f32 1.0, %v531_v0 }
 0xc1f   :  { %v533_v5 = vmul.f32 %v1467_v60, %v532_v4 }
 0xc21   :  { %v534_v6 = vadd.f32 %v1467_v60, %v533_v5 }
 0xc23   :  { %v538_v11 = vsel %vm537_vm5, %v1467_v60, %v534_v6 }
 0xc24   :  { %v543_v13 = vsel %vm540_vm6, %v542_v12, %v538_v11 }
 0xc25   :  { %v549_v21 = vmul.f32 %v547_v20, %v543_v13 }
 0xc60   :  { %v806_v1 = vpop.permute.xlu2 %805 }
 0xc61   :  { %v808_v3 = vmul.f32 %v806_v1, %v796_v2 }
 0xc63   :  { %810 = vrot.lane.b32.xlu2 %v808_v3, %s1679_s26 }
 0xc72   :  { %v552_v7 = vpop.permute.xlu1 %551 }
 0xc73   :  { %v554_v14 = vmul.f32 %v552_v7, %v543_v13 }
 0xc75   :  { %556 = vrot.lane.b32.xlu0 %v554_v14, %s1679_s26 }
 0xc7a   :  { %v801_v15 = vpop.permute.xlu1 %800 }
 0xc7b   :  { %v803_v16 = vmul.f32 %v801_v15, %v796_v2 }
 0xcbd   :  { %v811_v17 = vpop.permute.xlu2 %810 }
 0xcbe   :  { %v1883_v18 = vadd.f32 %v811_v17, %v803_v16 }
 0xcc0   :  { %1468 = vtanh.f32 %v1883_v18  ;;  %v870_v14 = vrot.slane %v1883_v18, 6 }
 0xcc6   :  { %v1469_v19 = vpop.eup %1468 }
 0xcc7   :  { %816 = vrot.lane.b32.xlu1 %v1469_v19, %s1678_s23 }
 0xce7   :  { %v557_v22 = vpop.permute.xlu0 %556 }
 0xce8   :  { %v1888_v23 = vadd.f32 %v557_v22, %v549_v21 }
 0xcea   :  { %1470 = vtanh.f32 %v1888_v23  ;;  %v617_v20 = vrot.slane %v1888_v23, 6 }
 0xcf0   :  { %v1471_v24 = vpop.eup %1470 }
 0xcf1   :  { %562 = vrot.lane.b32.xlu0 %v1471_v24, %s1678_s23 }
 0xd39   :  { %v817_v25 = vpop.permute.xlu1 %816 }
 0xd3a   :  { %v819_v27 = vmul.f32 %v817_v25, %v796_v2 }
 0xd3c   :  { %821 = vrot.lane.b32.xlu0 %v819_v27, %s1679_s26 }
 0xd63   :  { %v563_v28 = vpop.permute.xlu0 %562 }
 0xd64   :  { %v1893_v29 = vmul.f32 %v563_v28, %v543_v13 }
 0xd66   :  { %v567_v36 = vrot.slane %v1893_v29, 2  ;;  %v711_v28 = vsel %vm706_vm15, %v1824_v30, %v1893_v29 }
 0xd68   :  { %568 = vrot.lane.b32.xlu2 %v567_v36, %s1679_s26 }
 0xdae   :  { %v822_v37 = vpop.permute.xlu0 %821 }
 0xdc2   :  { %v569_v26 = vpop.permute.xlu2 %568 }
 0xdc3   :  { %1381 = vmatmul.msk.f32.vlgmr.msrb.gmra.mxu0 %vm155_vm2, %v569_v26 }
 0xdc4   :  { %1047 = vmatpush.msrb.mxu0 %v1828_v31 }
 0xdc6   :  { %1048 = vmatpush.msrb.mxu0 %v1830_v32 }
 0xdc8   :  { %1049 = vmatpush.msrb.mxu0 %v1834_v33 }
 0xdca   :  { %1050 = vmatpush.msrb.mxu0 %v1840_v34 }
 0xdcb   :  { %1389 = vmatmul.msk.f32.vlgmr.msra.gmra.mxu0 %vm155_vm2, %v822_v37 }
 0xe40   :  { %v589_v38 = vpop.f32.mrf.mxu0 }
 0xe41   :  { %v593_v39 = vrot.slane %v589_v38, 4 }
 0xe43   :  { %v595_v40 = vadd.f32 %v593_v39, %v1813_v63 }
 0xe45   :  { %1472 = vtanh.f32 %v595_v40  ;;  %v1382_v49 = vmul.f32 -1.442695, %v595_v40 }
 0xe48   :  { %v842_v41 = vpop.f32.mrf.mxu0 }
 0xe49   :  { %v846_v43 = vrot.slane %v842_v41, 6 }
 0xe4b   :  { %v1473_v44 = vpop.eup %1472  ;;  %v848_v45 = vadd.f32 %v846_v43, %v1872_v42 }
 0xe4c   :  { %621 = vrot.lane.b32.xlu1 %v1473_v44, %s1678_s23 }
 0xe4d   :  { %1474 = vtanh.f32 %v848_v45  ;;  %v1390_v9 = vmul.f32 -1.442695, %v848_v45 }
 0xe4f   :  { %1476 = vpow2.f32 %v1390_v9 }
 0xe53   :  { %v1475_v46 = vpop.eup %1474 }
 0xe54   :  { %874 = vrot.lane.b32.xlu2 %v1475_v46, %s1678_s23 }
 0xe55   :  { %v1477_v47 = vpop.eup %1476 }
 0xe56   :  { %v852_v48 = vadd.f32 1.0, %v1477_v47 }
 0xe58   :  { %1478 = vrcp.f32 %v852_v48  ;;  %v864_v58 = vand.u32 2147483648, %v852_v48  ;;  %vm858_vm8 = vweird.f32 %v852_v48  ;;  %v862_v59 = vand.u32 2147483647, %v852_v48 }
 0xe59   :  { %1480 = vpow2.f32 %v1382_v49 }
 0xe5a   :  { %v865_v62 = vor.u32 1.1754944e-38, %v864_v58  ;;  %vm863_vm10 = vcmp.eq.f32.partialorder %v862_v59, 8.507059e+37 }
 0xe5e   :  { %v1479_v50 = vpop.eup %1478 }
 0xe5f   :  { %v1481_v51 = vpop.eup %1480  ;;  %v854_v52 = vmul.f32 %v1479_v50, %v852_v48  ;;  %vm859_vm1 = vweird.f32 %v1479_v50 }
 0xe60   :  { %v599_v53 = vadd.f32 1.0, %v1481_v51  ;;  %vm860_vm9 = vmor %vm858_vm8, %vm859_vm1 }
 0xe61   :  { %v855_v54 = vsub.f32 1.0, %v854_v52 }
 0xe62   :  { %1482 = vrcp.f32 %v599_v53  ;;  %v611_v6 = vand.u32 2147483648, %v599_v53  ;;  %vm605_vm12 = vweird.f32 %v599_v53  ;;  %v609_v8 = vand.u32 2147483647, %v599_v53 }
 0xe63   :  { %v856_v55 = vmul.f32 %v1479_v50, %v855_v54 }
 0xe64   :  { %v612_v11 = vor.u32 1.1754944e-38, %v611_v6  ;;  %vm610_vm14 = vcmp.eq.f32.partialorder %v609_v8, 8.507059e+37 }
 0xe65   :  { %v857_v56 = vadd.f32 %v1479_v50, %v856_v55 }
 0xe67   :  { %v861_v60 = vsel %vm860_vm9, %v1479_v50, %v857_v56 }
 0xe68   :  { %v1483_v57 = vpop.eup %1482  ;;  %v866_v1 = vsel %vm863_vm10, %v865_v62, %v861_v60 }
 0xe69   :  { %v601_v61 = vmul.f32 %v1483_v57, %v599_v53  ;;  %vm606_vm11 = vweird.f32 %v1483_v57  ;;  %v872_v15 = vmul.f32 %v870_v14, %v866_v1 }
 0xe6a   :  { %vm607_vm13 = vmor %vm605_vm12, %vm606_vm11 }
 0xe6b   :  { %v602_v3 = vsub.f32 1.0, %v601_v61 }
 0xe6d   :  { %v603_v4 = vmul.f32 %v1483_v57, %v602_v3 }
 0xe6f   :  { %v604_v5 = vadd.f32 %v1483_v57, %v603_v4 }
 0xe71   :  { %v608_v10 = vsel %vm607_vm13, %v1483_v57, %v604_v5 }
 0xe72   :  { %v613_v7 = vsel %vm610_vm14, %v612_v11, %v608_v10 }
 0xe73   :  { %v619_v21 = vmul.f32 %v617_v20, %v613_v7 }
 0xeae   :  { %v875_v0 = vpop.permute.xlu2 %874 }
 0xeaf   :  { %v877_v2 = vmul.f32 %v875_v0, %v866_v1 }
 0xeb1   :  { %879 = vrot.lane.b32.xlu1 %v877_v2, %s1679_s26 }
 0xebe   :  { %v622_v12 = vpop.permute.xlu1 %621 }
 0xebf   :  { %v624_v13 = vmul.f32 %v622_v12, %v613_v7 }
 0xec1   :  { %626 = vrot.lane.b32.xlu0 %v624_v13, %s1679_s26 }
 0xf23   :  { %v880_v16 = vpop.permute.xlu1 %879 }
 0xf24   :  { %v1910_v17 = vadd.f32 %v880_v16, %v872_v15 }
 0xf26   :  { %1484 = vtanh.f32 %v1910_v17  ;;  %v940_v58 = vrot.slane %v1910_v17, 6 }
 0xf2c   :  { %v1485_v19 = vpop.eup %1484 }
 0xf2d   :  { %885 = vrot.lane.b32.xlu0 %v1485_v19, %s1678_s23 }
 0xf33   :  { %v627_v22 = vpop.permute.xlu0 %626 }
 0xf34   :  { %v1915_v24 = vadd.f32 %v627_v22, %v619_v21 }
 0xf36   :  { %1486 = vtanh.f32 %v1915_v24 }
 0xf3c   :  { %v1487_v25 = vpop.eup %1486 }
 0xf3d   :  { %632 = vrot.lane.b32.xlu2 %v1487_v25, %s1678_s23  ;;  %v687_v25 = vrot.slane %v1915_v24, 6 }
 0xf97   :  { %v633_v18 = vpop.permute.xlu2 %632 }
 0xf98   :  { %v635_v27 = vmul.f32 %v633_v18, %v613_v7 }
 0xf9a   :  { %v637_v36 = vrot.slane %v635_v27, 4  ;;  %v1923_v26 = vsel %vm128_vm0, %v711_v28, %v635_v27 }
 0xf9c   :  { %638 = vrot.lane.b32.xlu1 %v637_v36, %s1679_s26 }
 0xf9f   :  { %v886_v23 = vpop.permute.xlu0 %885 }
 0xfa0   :  { %v888_v37 = vmul.f32 %v886_v23, %v866_v1 }
 0xfa2   :  { %v890_v38 = vrot.slane %v888_v37, 2 }
 0xfa4   :  { %891 = vrot.lane.b32.xlu2 %v890_v38, %s1679_s26 }
 0xffe   :  { %v892_v30 = vpop.permute.xlu2 %891 }
0x100e   :  { %v639_v39 = vpop.permute.xlu1 %638 }
0x100f   :  { %1383 = vmatmul.msk.f32.vlgmr.msra.gmra.mxu1 %vm155_vm2, %v639_v39 }
0x1010   :  { %1113 = vmatpush.msra.mxu1 %v1828_v31 }
0x1012   :  { %1114 = vmatpush.msra.mxu1 %v1830_v32 }
0x1014   :  { %1115 = vmatpush.msra.mxu1 %v1834_v33 }
0x1016   :  { %1116 = vmatpush.msra.mxu1 %v1840_v34 }
0x1017   :  { %1391 = vmatmul.msk.f32.vlgmr.msrb.gmra.mxu1 %vm155_vm2, %v892_v30 }
0x108c   :  { %v659_v29 = vpop.f32.mrf.mxu1 }
0x108d   :  { %v663_v50 = vrot.slane %v659_v29, 2 }
0x108f   :  { %v665_v53 = vadd.f32 %v663_v50, %v1813_v63 }
0x1091   :  { %v1384_v63 = vmul.f32 -1.442695, %v665_v53 }
0x1094   :  { %v912_v40 = vpop.f32.mrf.mxu1 }
0x1095   :  { %v916_v41 = vrot.slane %v912_v40, 4 }
0x1097   :  { %v918_v43 = vadd.f32 %v916_v41, %v1872_v42 }
0x1099   :  { %1488 = vtanh.f32 %v918_v43  ;;  %v1392_v45 = vmul.f32 -1.442695, %v918_v43 }
0x109b   :  { %1490 = vpow2.f32 %v1392_v45 }
0x109f   :  { %v1489_v44 = vpop.eup %1488 }
0x10a0   :  { %944 = vrot.lane.b32.xlu0 %v1489_v44, %s1678_s23 }
0x10a1   :  { %v1491_v31 = vpop.eup %1490 }
0x10a2   :  { %v922_v32 = vadd.f32 1.0, %v1491_v31 }
0x10a4   :  { %1492 = vrcp.f32 %v922_v32  ;;  %v934_v48 = vand.u32 2147483648, %v922_v32  ;;  %vm928_vm4 = vweird.f32 %v922_v32  ;;  %v932_v49 = vand.u32 2147483647, %v922_v32 }
0x10a5   :  { %1494 = vtanh.f32 %v665_v53 }
0x10a6   :  { %v935_v52 = vor.u32 1.1754944e-38, %v934_v48  ;;  %vm933_vm6 = vcmp.eq.f32.partialorder %v932_v49, 8.507059e+37 }
0x10aa   :  { %v1493_v33 = vpop.eup %1492 }
0x10ab   :  { %v924_v46 = vmul.f32 %v1493_v33, %v922_v32  ;;  %vm929_vm3 = vweird.f32 %v1493_v33  ;;  %v1495_v57 = vpop.eup %1494 }
0x10ac   :  { %vm930_vm5 = vmor %vm928_vm4, %vm929_vm3 }
0x10ad   :  { %v925_v9 = vsub.f32 1.0, %v924_v46 }
0x10af   :  { %v926_v34 = vmul.f32 %v1493_v33, %v925_v9 }
0x10b1   :  { %v927_v47 = vadd.f32 %v1493_v33, %v926_v34 }
0x10b3   :  { %v931_v51 = vsel %vm930_vm5, %v1493_v33, %v927_v47 }
0x10b4   :  { %v936_v55 = vsel %vm933_vm6, %v935_v52, %v931_v51 }
0x10b5   :  { %v942_v59 = vmul.f32 %v940_v58, %v936_v55 }
0x1112   :  { %v945_v54 = vpop.permute.xlu0 %944 }
0x1113   :  { %v947_v56 = vmul.f32 %v945_v54, %v936_v55 }
0x1115   :  { %949 = vrot.lane.b32.xlu1 %v947_v56, %s1679_s26 }
0x111d   :  { %691 = vrot.lane.b32.xlu1 %v1495_v57, %s1678_s23 }
0x1187   :  { %v950_v60 = vpop.permute.xlu1 %949 }
0x1188   :  { %v1939_v61 = vadd.f32 %v950_v60, %v942_v59 }
0x118a   :  { %1496 = vtanh.f32 %v1939_v61  ;;  %v1010_v47 = vrot.slane %v1939_v61, 6 }
0x118b   :  { %1498 = vpow2.f32 %v1384_v63 }
0x118f   :  { %v692_v15 = vpop.permute.xlu1 %691 }
0x1190   :  { %v1497_v62 = vpop.eup %1496 }
0x1191   :  { %955 = vrot.lane.b32.xlu2 %v1497_v62, %s1678_s23  ;;  %v1499_v0 = vpop.eup %1498 }
0x1192   :  { %v669_v1 = vadd.f32 1.0, %v1499_v0 }
0x1194   :  { %1500 = vrcp.f32 %v669_v1  ;;  %v681_v12 = vand.u32 2147483648, %v669_v1  ;;  %vm675_vm8 = vweird.f32 %v669_v1  ;;  %v679_v7 = vand.u32 2147483647, %v669_v1 }
0x1196   :  { %v682_v14 = vor.u32 1.1754944e-38, %v681_v12  ;;  %vm680_vm10 = vcmp.eq.f32.partialorder %v679_v7, 8.507059e+37 }
0x119a   :  { %v1501_v2 = vpop.eup %1500 }
0x119b   :  { %v671_v3 = vmul.f32 %v1501_v2, %v669_v1  ;;  %vm676_vm1 = vweird.f32 %v1501_v2 }
0x119c   :  { %vm677_vm9 = vmor %vm675_vm8, %vm676_vm1 }
0x119d   :  { %v672_v4 = vsub.f32 1.0, %v671_v3 }
0x119f   :  { %v673_v5 = vmul.f32 %v1501_v2, %v672_v4 }
0x11a1   :  { %v674_v10 = vadd.f32 %v1501_v2, %v673_v5 }
0x11a3   :  { %v678_v13 = vsel %vm677_vm9, %v1501_v2, %v674_v10 }
0x11a4   :  { %v683_v16 = vsel %vm680_vm10, %v682_v14, %v678_v13 }
0x11a5   :  { %v694_v17 = vmul.f32 %v692_v15, %v683_v16  ;;  %v689_v27 = vmul.f32 %v687_v25, %v683_v16 }
0x11eb   :  { %v956_v6 = vpop.permute.xlu2 %955 }
0x11ec   :  { %v958_v8 = vmul.f32 %v956_v6, %v936_v55 }
0x11ee   :  { %v960_v11 = vrot.slane %v958_v8, 4 }
0x11f0   :  { %961 = vrot.lane.b32.xlu0 %v960_v11, %s1679_s26 }
0x11f8   :  { %696 = vrot.lane.b32.xlu0 %v694_v17, %s1679_s26 }
0x1262   :  { %v962_v19 = vpop.permute.xlu0 %961 }
0x1263   :  { %1393 = vmatmul.msk.f32.vlgmr.msrb.gmra.mxu3 %vm155_vm2, %v962_v19 }
0x126a   :  { %v697_v18 = vpop.permute.xlu0 %696 }
0x126b   :  { %v699_v28 = vadd.f32 %v697_v18, %v689_v27 }
0x12e6   :  { %v982_v20 = vpop.f32.mrf.mxu3 }
0x12e7   :  { %v986_v21 = vrot.slane %v982_v20, 2 }
0x12e9   :  { %v988_v22 = vadd.f32 %v986_v21, %v1872_v42 }
0x12eb   :  { %1502 = vtanh.f32 %v988_v22  ;;  %v1394_v37 = vmul.f32 -1.442695, %v988_v22 }
0x12ec   :  { %1504 = vtanh.f32 %v699_v28 }
0x12ed   :  { %1506 = vpow2.f32 %v1394_v37 }
0x12f1   :  { %v1503_v36 = vpop.eup %1502 }
0x12f2   :  { %1014 = vrot.lane.b32.xlu2 %v1503_v36, %s1678_s23  ;;  %v1505_v23 = vpop.eup %1504 }
0x12f3   :  { %v1507_v38 = vpop.eup %1506 }
0x12f4   :  { %v992_v39 = vadd.f32 1.0, %v1507_v38 }
0x12f6   :  { %1508 = vrcp.f32 %v992_v39  ;;  %v1004_v41 = vand.u32 2147483648, %v992_v39  ;;  %vm998_vm12 = vweird.f32 %v992_v39  ;;  %v1002_v43 = vand.u32 2147483647, %v992_v39 }
0x12f8   :  { %v1005_v45 = vor.u32 1.1754944e-38, %v1004_v41  ;;  %vm1003_vm14 = vcmp.eq.f32.partialorder %v1002_v43, 8.507059e+37 }
0x12fa   :  { %702 = vrot.lane.b32.xlu2 %v1505_v23, %s1678_s23 }
0x12fc   :  { %v1509_v30 = vpop.eup %1508 }
0x12fd   :  { %v994_v42 = vmul.f32 %v1509_v30, %v992_v39  ;;  %vm999_vm11 = vweird.f32 %v1509_v30 }
0x12fe   :  { %vm1000_vm13 = vmor %vm998_vm12, %vm999_vm11 }
0x12ff   :  { %v995_v29 = vsub.f32 1.0, %v994_v42 }
0x1301   :  { %v996_v24 = vmul.f32 %v1509_v30, %v995_v29 }
0x1303   :  { %v997_v40 = vadd.f32 %v1509_v30, %v996_v24 }
0x1305   :  { %v1001_v44 = vsel %vm1000_vm13, %v1509_v30, %v997_v40 }
0x1306   :  { %v1006_v32 = vsel %vm1003_vm14, %v1005_v45, %v1001_v44 }
0x1307   :  { %v1012_v48 = vmul.f32 %v1010_v47, %v1006_v32 }
0x134c   :  { %v1015_v31 = vpop.permute.xlu2 %1014 }
0x134d   :  { %v1017_v33 = vmul.f32 %v1015_v31, %v1006_v32 }
0x134f   :  { %1019 = vrot.lane.b32.xlu1 %v1017_v33, %s1679_s26 }
0x1354   :  { %v703_v46 = vpop.permute.xlu2 %702 }
0x1355   :  { %v1951_v9 = vmul.f32 %v703_v46, %v683_v16 }
0x1357   :  { %v713_v34 = vsel %vm709_vm7, %v1923_v26, %v1951_v9 }
0x1358   :  { %726 = vrot.lane.b32.xlu1 %v713_v34, %s1679_s26 }
0x13c1   :  { %v1020_v49 = vpop.permute.xlu1 %1019 }
0x13c2   :  { %v1022_v50 = vadd.f32 %v1020_v49, %v1012_v48 }
0x13c4   :  { %1510 = vtanh.f32 %v1022_v50  ;;  %v1077_v7 = vrot.slane %v1022_v50, 6 }
0x13ca   :  { %v1511_v51 = vpop.eup %1510  ;;  %v727_v52 = vpop.permute.xlu1 %726 }
0x13cb   :  { %1025 = vrot.lane.b32.xlu0 %v1511_v51, %s1678_s23  ;;  %1386 = vmatmul.msk.f32.gmra.mxu2 %vm155_vm2, %v727_v52 }
0x143d   :  { %v1026_v53 = vpop.permute.xlu0 %1025 }
0x143e   :  { %v1028_v54 = vmul.f32 %v1026_v53, %v1006_v32 }
0x1440   :  { %v1030_v55 = vrot.slane %v1028_v54, 6 }
0x1442   :  { %1031 = vrot.lane.b32.xlu2 %v1030_v55, %s1679_s26 }
0x144e   :  { %v752_v56 = vpop.f32.mrf.mxu2 }
0x144f   :  { %v1963_v57 = vadd.f32 %v1868_v35, %v752_v56 }
0x149c   :  { %v1032_v26 = vpop.permute.xlu2 %1031 }
0x149d   :  { %1395 = vmatmul.msk.f32.vlgmr.msrb.gmra.mxu0 %vm155_vm2, %v1032_v26 }
0x151a   :  { %v1052_v58 = vpop.f32.mrf.mxu0 }
0x151b   :  { %v1055_v59 = vadd.f32 %v1052_v58, %v1963_v57 }
0x151d   :  { %1512 = vtanh.f32 %v1055_v59  ;;  %v1396_v61 = vmul.f32 -1.442695, %v1055_v59 }
0x151f   :  { %1514 = vpow2.f32 %v1396_v61 }
0x1523   :  { %v1513_v60 = vpop.eup %1512 }
0x1524   :  { %1081 = vrot.lane.b32.xlu0 %v1513_v60, %s1678_s23 }
0x1525   :  { %v1515_v62 = vpop.eup %1514 }
0x1526   :  { %v1059_v63 = vadd.f32 1.0, %v1515_v62 }
0x1528   :  { %1516 = vrcp.f32 %v1059_v63  ;;  %v1071_v35 = vand.u32 2147483648, %v1059_v63  ;;  %vm1065_vm3 = vweird.f32 %v1059_v63  ;;  %v1069_v5 = vand.u32 2147483647, %v1059_v63 }
0x152a   :  { %v1072_v8 = vor.u32 1.1754944e-38, %v1071_v35  ;;  %vm1070_vm5 = vcmp.eq.f32.partialorder %v1069_v5, 8.507059e+37 }
0x152e   :  { %v1517_v0 = vpop.eup %1516 }
0x152f   :  { %v1061_v1 = vmul.f32 %v1517_v0, %v1059_v63  ;;  %vm1066_vm7 = vweird.f32 %v1517_v0 }
0x1530   :  { %vm1067_vm4 = vmor %vm1065_vm3, %vm1066_vm7 }
0x1531   :  { %v1062_v2 = vsub.f32 1.0, %v1061_v1 }
0x1533   :  { %v1063_v3 = vmul.f32 %v1517_v0, %v1062_v2 }
0x1535   :  { %v1064_v4 = vadd.f32 %v1517_v0, %v1063_v3 }
0x1537   :  { %v1068_v6 = vsel %vm1067_vm4, %v1517_v0, %v1064_v4 }
0x1538   :  { %v1073_v11 = vsel %vm1070_vm5, %v1072_v8, %v1068_v6 }
0x1539   :  { %v1079_v13 = vmul.f32 %v1077_v7, %v1073_v11 }
0x1596   :  { %v1082_v10 = vpop.permute.xlu0 %1081 }
0x1597   :  { %v1084_v12 = vmul.f32 %v1082_v10, %v1073_v11 }
0x1599   :  { %1086 = vrot.lane.b32.xlu1 %v1084_v12, %s1679_s26 }
0x160b   :  { %v1087_v14 = vpop.permute.xlu1 %1086 }
0x160c   :  { %v1089_v15 = vadd.f32 %v1087_v14, %v1079_v13 }
0x160e   :  { %1518 = vtanh.f32 %v1089_v15  ;;  %v1146_v45 = vrot.slane %v1089_v15, 6 }
0x1614   :  { %v1519_v16 = vpop.eup %1518 }
0x1615   :  { %1092 = vrot.lane.b32.xlu2 %v1519_v16, %s1678_s23 }
0x166f   :  { %v1093_v17 = vpop.permute.xlu2 %1092 }
0x1670   :  { %v1095_v19 = vmul.f32 %v1093_v17, %v1073_v11 }
0x1672   :  { %1097 = vrot.lane.b32.xlu0 %v1095_v19, %s1679_s26 }
0x16e4   :  { %v1098_v20 = vpop.permute.xlu0 %1097 }
0x16e5   :  { %1397 = vmatmul.msk.f32.vlgmr.msra.gmra.mxu1 %vm155_vm2, %v1098_v20 }
0x1762   :  { %v1118_v21 = vpop.f32.mrf.mxu1 }
0x1763   :  { %v1122_v22 = vrot.slane %v1118_v21, 6 }
0x1765   :  { %v1124_v25 = vadd.f32 %v1122_v22, %v1963_v57 }
0x1767   :  { %1520 = vtanh.f32 %v1124_v25  ;;  %v1398_v27 = vmul.f32 -1.442695, %v1124_v25 }
0x1769   :  { %1522 = vpow2.f32 %v1398_v27 }
0x176d   :  { %v1521_v18 = vpop.eup %1520 }
0x176e   :  { %1150 = vrot.lane.b32.xlu1 %v1521_v18, %s1678_s23 }
0x176f   :  { %v1523_v28 = vpop.eup %1522 }
0x1770   :  { %v1128_v36 = vadd.f32 1.0, %v1523_v28 }
0x1772   :  { %1524 = vrcp.f32 %v1128_v36  ;;  %v1140_v42 = vand.u32 2147483648, %v1128_v36  ;;  %vm1134_vm1 = vweird.f32 %v1128_v36  ;;  %v1138_v29 = vand.u32 2147483647, %v1128_v36 }
0x1774   :  { %v1141_v40 = vor.u32 1.1754944e-38, %v1140_v42  ;;  %vm1139_vm9 = vcmp.eq.f32.partialorder %v1138_v29, 8.507059e+37 }
0x1778   :  { %v1525_v23 = vpop.eup %1524 }
0x1779   :  { %v1130_v37 = vmul.f32 %v1525_v23, %v1128_v36  ;;  %vm1135_vm6 = vweird.f32 %v1525_v23 }
0x177a   :  { %vm1136_vm8 = vmor %vm1134_vm1, %vm1135_vm6 }
0x177b   :  { %v1131_v38 = vsub.f32 1.0, %v1130_v37 }
0x177d   :  { %v1132_v39 = vmul.f32 %v1525_v23, %v1131_v38 }
0x177f   :  { %v1133_v30 = vadd.f32 %v1525_v23, %v1132_v39 }
0x1781   :  { %v1137_v24 = vsel %vm1136_vm8, %v1525_v23, %v1133_v30 }
0x1782   :  { %v1142_v43 = vsel %vm1139_vm9, %v1141_v40, %v1137_v24 }
0x1783   :  { %v1148_v31 = vmul.f32 %v1146_v45, %v1142_v43  ;;  %v1314_v45 = vld [vmem:[#allocation8 + $0x8] sm:$0xff] }
0x17e0   :  { %v1151_v41 = vpop.permute.xlu1 %1150 }
0x17e1   :  { %v1153_v44 = vmul.f32 %v1151_v41, %v1142_v43 }
0x17e3   :  { %1155 = vrot.lane.b32.xlu2 %v1153_v44, %s1679_s26  ;;  %v1315_v44 = vld [vmem:[#allocation8 + $0x10] sm:$0xff] }
0x183d   :  { %v1156_v32 = vpop.permute.xlu2 %1155 }
0x183e   :  { %v1158_v33 = vadd.f32 %v1156_v32, %v1148_v31  ;;  %v1313_v31 = vld [vmem:[#allocation8] sm:$0xff] }
0x1840   :  { %1526 = vtanh.f32 %v1158_v33  ;;  %v1216_v35 = vrot.slane %v1158_v33, 6 }
0x1846   :  { %v1527_v46 = vpop.eup %1526 }
0x1847   :  { %1161 = vrot.lane.b32.xlu0 %v1527_v46, %s1678_s23  ;;  %v1306_v46 = vrot.slane %v1951_v9, 6 }
0x18b9   :  { %v1162_v34 = vpop.permute.xlu0 %1161 }
0x18ba   :  { %v1164_v47 = vmul.f32 %v1162_v34, %v1142_v43  ;;  %v1316_v43 = vld [vmem:[#allocation8 + $0x18] sm:$0xff] }
0x18bb   :  { %1338 = vmatpush.msra.mxu0 %v1316_v43 }
0x18bc   :  { %v1166_v48 = vrot.slane %v1164_v47, 2 }
0x18bd   :  { %1339 = vmatpush.msra.mxu0 %v1315_v44 }
0x18be   :  { %1167 = vrot.lane.b32.xlu1 %v1166_v48, %s1679_s26 }
0x18bf   :  { %1340 = vmatpush.msra.mxu0 %v1314_v45 }
0x18c1   :  { %1341 = vmatpush.msra.mxu0 %v1313_v31 }
0x1930   :  { %v1168_v49 = vpop.permute.xlu1 %1167 }
0x1931   :  { %1399 = vmatmul.msk.f32.vlgmr.msrb.gmra.mxu2 %vm155_vm2, %v1168_v49 }
0x19b4   :  { %v1188_v50 = vpop.f32.mrf.mxu2 }
0x19b5   :  { %v1192_v51 = vrot.slane %v1188_v50, 4  ;;  %v1415_v50 = vld [vmem:[%s2008_s10] ss:$0 sm:$0xff] }
0x19b7   :  { %v1194_v52 = vadd.f32 %v1192_v51, %v1963_v57 }
0x19b9   :  { %1528 = vtanh.f32 %v1194_v52  ;;  %v1400_v54 = vmul.f32 -1.442695, %v1194_v52 }
0x19bb   :  { %1530 = vpow2.f32 %v1400_v54 }
0x19bf   :  { %v1529_v53 = vpop.eup %1528 }
0x19c0   :  { %1220 = vrot.lane.b32.xlu2 %v1529_v53, %s1678_s23 }
0x19c1   :  { %v1531_v55 = vpop.eup %1530 }
0x19c2   :  { %v1198_v26 = vadd.f32 1.0, %v1531_v55 }
0x19c4   :  { %1532 = vrcp.f32 %v1198_v26  ;;  %v1210_v62 = vand.u32 2147483648, %v1198_v26  ;;  %vm1204_vm11 = vweird.f32 %v1198_v26  ;;  %v1208_v63 = vand.u32 2147483647, %v1198_v26 }
0x19c6   :  { %v1211_v1 = vor.u32 1.1754944e-38, %v1210_v62  ;;  %vm1209_vm13 = vcmp.eq.f32.partialorder %v1208_v63, 8.507059e+37 }
0x19ca   :  { %v1533_v56 = vpop.eup %1532 }
0x19cb   :  { %v1200_v58 = vmul.f32 %v1533_v56, %v1198_v26  ;;  %vm1205_vm10 = vweird.f32 %v1533_v56 }
0x19cc   :  { %vm1206_vm12 = vmor %vm1204_vm11, %vm1205_vm10 }
0x19cd   :  { %v1201_v59 = vsub.f32 1.0, %v1200_v58 }
0x19cf   :  { %v1202_v60 = vmul.f32 %v1533_v56, %v1201_v59 }
0x19d1   :  { %v1203_v61 = vadd.f32 %v1533_v56, %v1202_v60 }
0x19d3   :  { %v1207_v0 = vsel %vm1206_vm12, %v1533_v56, %v1203_v61 }
0x19d4   :  { %v1212_v3 = vsel %vm1209_vm13, %v1211_v1, %v1207_v0 }
0x19d5   :  { %v1218_v5 = vmul.f32 %v1216_v35, %v1212_v3 }
0x1a1a   :  { %v1221_v2 = vpop.permute.xlu2 %1220 }
0x1a1b   :  { %v1223_v4 = vmul.f32 %v1221_v2, %v1212_v3 }
0x1a1d   :  { %1225 = vrot.lane.b32.xlu0 %v1223_v4, %s1679_s26 }
0x1a8f   :  { %v1226_v6 = vpop.permute.xlu0 %1225 }
0x1a90   :  { %v1228_v8 = vadd.f32 %v1226_v6, %v1218_v5 }
0x1a92   :  { %1534 = vtanh.f32 %v1228_v8  ;;  %v1286_v42 = vrot.slane %v1228_v8, 6 }
0x1a98   :  { %v1535_v10 = vpop.eup %1534 }
0x1a99   :  { %1231 = vrot.lane.b32.xlu1 %v1535_v10, %s1678_s23 }
0x1b0b   :  { %v1232_v11 = vpop.permute.xlu1 %1231 }
0x1b0c   :  { %v1234_v12 = vmul.f32 %v1232_v11, %v1212_v3 }
0x1b0e   :  { %v1236_v7 = vrot.slane %v1234_v12, 4 }
0x1b10   :  { %1237 = vrot.lane.b32.xlu2 %v1236_v7, %s1679_s26 }
0x1b6a   :  { %v1238_v13 = vpop.permute.xlu2 %1237 }
0x1b6b   :  { %1401 = vmatmul.msk.f32.vlgmr.msra.gmra.mxu3 %vm155_vm2, %v1238_v13 }
0x1bee   :  { %v1258_v14 = vpop.f32.mrf.mxu3 }
0x1bef   :  { %v1262_v15 = vrot.slane %v1258_v14, 2 }
0x1bf1   :  { %v1264_v16 = vadd.f32 %v1262_v15, %v1963_v57 }
0x1bf3   :  { %1536 = vtanh.f32 %v1264_v16  ;;  %v1402_v19 = vmul.f32 -1.442695, %v1264_v16 }
0x1bf5   :  { %1538 = vpow2.f32 %v1402_v19 }
0x1bf9   :  { %v1537_v17 = vpop.eup %1536 }
0x1bfa   :  { %1290 = vrot.lane.b32.xlu0 %v1537_v17, %s1678_s23 }
0x1bfb   :  { %v1539_v20 = vpop.eup %1538 }
0x1bfc   :  { %v1268_v21 = vadd.f32 1.0, %v1539_v20 }
0x1bfe   :  { %1540 = vrcp.f32 %v1268_v21  ;;  %v1280_v36 = vand.u32 2147483648, %v1268_v21  ;;  %vm1274_vm7 = vweird.f32 %v1268_v21  ;;  %v1278_v23 = vand.u32 2147483647, %v1268_v21 }
0x1c00   :  { %v1281_v37 = vor.u32 1.1754944e-38, %v1280_v36  ;;  %vm1279_vm4 = vcmp.eq.f32.partialorder %v1278_v23, 8.507059e+37 }
0x1c04   :  { %v1541_v22 = vpop.eup %1540 }
0x1c05   :  { %v1270_v25 = vmul.f32 %v1541_v22, %v1268_v21  ;;  %vm1275_vm14 = vweird.f32 %v1541_v22 }
0x1c06   :  { %vm1276_vm3 = vmor %vm1274_vm7, %vm1275_vm14 }
0x1c07   :  { %v1271_v18 = vsub.f32 1.0, %v1270_v25 }
0x1c09   :  { %v1272_v27 = vmul.f32 %v1541_v22, %v1271_v18 }
0x1c0b   :  { %v1273_v28 = vadd.f32 %v1541_v22, %v1272_v27 }
0x1c0d   :  { %v1277_v57 = vsel %vm1276_vm3, %v1541_v22, %v1273_v28 }
0x1c0e   :  { %v1282_v39 = vsel %vm1279_vm4, %v1281_v37, %v1277_v57 }
0x1c0f   :  { %v1288_v29 = vmul.f32 %v1286_v42, %v1282_v39 }
0x1c6c   :  { %v1291_v38 = vpop.permute.xlu0 %1290 }
0x1c6d   :  { %v1293_v30 = vmul.f32 %v1291_v38, %v1282_v39 }
0x1c6f   :  { %1295 = vrot.lane.b32.xlu1 %v1293_v30, %s1679_s26 }
0x1ce1   :  { %v1296_v24 = vpop.permute.xlu1 %1295 }
0x1ce2   :  { %v1298_v40 = vadd.f32 %v1296_v24, %v1288_v29 }
0x1ce4   :  { %1542 = vtanh.f32 %v1298_v40 }
0x1cea   :  { %v1543_v41 = vpop.eup %1542 }
0x1ceb   :  { %1301 = vrot.lane.b32.xlu2 %v1543_v41, %s1678_s23 }
0x1d45   :  { %v1302_v32 = vpop.permute.xlu2 %1301 }
0x1d46   :  { %v1304_v33 = vmul.f32 %v1302_v32, %v1282_v39 }
0x1d48   :  { %v1309_v34 = vrot.slane %v1304_v33, 4 }
0x1d4a   :  { %v1311_v47 = vsel %vm706_vm15, %v1306_v46, %v1309_v34 }
0x1d4b   :  { %v1312_v48 = vsel %vm128_vm0, %v1311_v47, 0.0 }
0x1d4c   :  { %1322 = vrot.lane.b32.xlu0 %v1312_v48, %s1679_s26 }
0x1dbe   :  { %v1323_v49 = vpop.permute.xlu0 %1322 }
0x1dbf   :  { %1403 = vmatmul.msk.f32.vlgmr.msra.gmra.mxu0 %vm155_vm2, %v1323_v49 }
0x1e3c   :  { %v1343_v9 = vpop.f32.mrf.mxu0 }
0x1e3d   :  { %v1344_v51 = vadd.f32 %v1415_v50, %v1343_v9 }
0x1e3f   :  { %1346 = vst [vmem:[#allocation10] sm:$0xff] %v1344_v51 }
0x1e40   :  { %1357 = dma.vmem_to_hbm [thread:$0]  %s1353_s13, 128, %s1355_s16, [#allocation4]  }
0x1e41   :  { %1670 = dma.done.wait [#allocation4], 128  }
0x1e42   :  { %1671 = vsyncadd [#allocation4], 4294967168 }
0x1e43   :  { %1362 = vsyncpa [#allocation3], 1 }
0x1e44   :  { %1363 = vsyncpa [#allocation6], 1 }
0x1e45   :  { %1364 = vsyncpa [#allocation9], 1 }
0x1e46   :  { %1365 = vsyncpa [#allocation4], 1 }

</bundles_post_ra>
